<compile_context>
chip_gen: v7x
topology: tpu7x:2x2x1
jax: 0.10.0
libtpu: 0.0.40
codegen_flags: <defaults>
</compile_context>

<pallas_src>
import jax
import jax.numpy as jnp
import numpy as np
from jax.experimental import pallas as pl
from jax.experimental.pallas import tpu as pltpu

POOL_K = 49            # AvgPool2d kernel size (both dims)
POOL_STRIDE = (16, 20)
OUT_CH = 128           # fixed by the module (LR-ASPP out_channels = 128)
BN_EPS = 1e-5


def _head_kernel(xf_ref, w0_ref, b0_ref, gate_ref, wp_ref, bp_ref, out_ref):
    # xf_ref  : (1, Cin, T)     -- spatial tile, channels on the MXU K axis
    # w0_ref  : (128, Cin)      -- b0 conv weight with BatchNorm folded in
    # b0_ref  : (128, 1)        -- folded BatchNorm bias
    # gate_ref: (1, 128, 1)     -- per-batch sigmoid gate (branch b1)
    # wp_ref  : (nclass, 128)   -- projection conv weight
    # bp_ref  : (nclass, 1)     -- projection conv bias
    # out_ref : (1, nclass, T)
    xf = xf_ref[0]                                                          # (Cin, T)

    # b0: 1x1 conv (BN folded) -> ReLU, then multiply by the b1 gate.
    conv0 = jnp.dot(w0_ref[...], xf, preferred_element_type=jnp.float32)    # (128, T)
    feat = jnp.maximum(conv0 + b0_ref[...], 0.0) * gate_ref[0]              # (128, T)

    # Fused projection conv: (nclass, 128) @ (128, T) + bias.
    proj = jnp.dot(wp_ref[...], feat, preferred_element_type=jnp.float32)   # (nclass, T)
    out_ref[0] = (proj + bp_ref[...]).astype(out_ref.dtype)


def _pick_hw_tile(hw, max_tile=1024):
    """Largest multiple of 128 that divides hw and is <= max_tile (else hw)."""
    best = None
    t = 128
    while t <= min(hw, max_tile):
        if hw % t == 0:
            best = t
        t += 128
    return best if best is not None else hw


@jax.jit
def head_forward(x, w0, gamma, beta, running_mean, running_var, w1, wp, bp):
    B, Cin, H, W = x.shape
    HW = H * W
    nclass = wp.shape[0]

    # The fused gate assumes the pooled map is 1x1 (true for 64x64 inputs).
    pooled_h = (H - POOL_K) // POOL_STRIDE[0] + 1
    pooled_w = (W - POOL_K) // POOL_STRIDE[1] + 1
    assert pooled_h == 1 and pooled_w == 1, "kernel fuses the 1x1 pooled-map case"

    # --- fold eval-mode BatchNorm into the b0 conv ------------------------
    s = gamma * jax.lax.rsqrt(running_var + BN_EPS)             # (128,)
    w0_folded = w0 * s[:, None]                                 # (128, Cin)
    b0_folded = (beta - s * running_mean).reshape(OUT_CH, 1)    # (128, 1)

    # --- tiny b1 branch precomputed on the wrapper side -------------------
    # AvgPool(49,49) -> 1x1 conv -> sigmoid; one value per (batch, channel).
    pooled = jnp.mean(x[:, :, :POOL_K, :POOL_K], axis=(2, 3))          # (B, Cin)
    gate = jax.nn.sigmoid(pooled @ w1.T).reshape(B, OUT_CH, 1)         # (B, 128, 1)

    x_flat = x.reshape(B, Cin, HW)
    bp2 = bp.reshape(nclass, 1)

    tile_hw = _pick_hw_tile(HW)           # lane-dense spatial tile
    grid = (B, HW // tile_hw)

    out = pl.pallas_call(
        _head_kernel,
        # NOTE: switching this dtype to jnp.bfloat16 would ~halve the HBM
        # writeback on this mem-bound kernel if downstream tolerates it.
        out_shape=jax.ShapeDtypeStruct((B, nclass, HW), x.dtype),
        grid_spec=pltpu.PrefetchScalarGridSpec(
            num_scalar_prefetch=0,
            grid=grid,
            in_specs=[
                pl.BlockSpec((1, Cin, tile_hw), lambda b, t: (b, 0, t)),
                pl.BlockSpec((OUT_CH, Cin), lambda b, t: (0, 0)),
                pl.BlockSpec((OUT_CH, 1), lambda b, t: (0, 0)),
                pl.BlockSpec((1, OUT_CH, 1), lambda b, t: (b, 0, 0)),
                pl.BlockSpec((nclass, OUT_CH), lambda b, t: (0, 0)),
                pl.BlockSpec((nclass, 1), lambda b, t: (0, 0)),
            ],
            out_specs=pl.BlockSpec((1, nclass, tile_hw), lambda b, t: (b, 0, t)),
        ),
        compiler_params=pltpu.CompilerParams(
            dimension_semantics=("parallel", "parallel")),
    )(x_flat, w0_folded, b0_folded, gate, wp, bp2)

    return out.reshape(B, nclass, H, W)


def _head_reference(x, w0, gamma, beta, mean, var, w1, wp, bp):
    # Pure-JAX reference for _Head (eval-mode BN), same semantics as PyTorch.
    s = gamma / jnp.sqrt(var + BN_EPS)
    conv0 = jnp.einsum('oc,bchw->bohw', w0, x)
    feat1 = jax.nn.relu(s[None, :, None, None] * (conv0 - mean[None, :, None, None])
                        + beta[None, :, None, None])
    pooled = jnp.mean(x[:, :, :POOL_K, :POOL_K], axis=(2, 3))             # (B, Cin)
    feat2 = jax.nn.sigmoid(jnp.einsum('oc,bc->bo', w1, pooled))           # (B, 128)
    y = feat1 * feat2[:, :, None, None]
    return jnp.einsum('nc,bchw->bnhw', wp, y) + bp[None, :, None, None]


if __name__ == "__main__":
    key = jax.random.PRNGKey(0)
    keys = jax.random.split(key, 9)

    B, Cin, H, W, NCLASS = 2, 8, 64, 64, 8   # H, W >= 49 so the pool window exists
    x = jax.random.normal(keys[0], (B, Cin, H, W), dtype=jnp.float32)

    w0 = jax.random.normal(keys[1], (OUT_CH, Cin), dtype=jnp.float32) * 0.1
    w1 = jax.random.normal(keys[2], (OUT_CH, Cin), dtype=jnp.float32) * 0.1
    gamma = 1.0 + 0.1 * jax.random.normal(keys[3], (OUT_CH,), dtype=jnp.float32)
    beta = 0.1 * jax.random.normal(keys[4], (OUT_CH,), dtype=jnp.float32)
    running_mean = 0.1 * jax.random.normal(keys[5], (OUT_CH,), dtype=jnp.float32)
    running_var = jnp.abs(jax.random.normal(keys[6], (OUT_CH,), dtype=jnp.float32)) + 0.5
    wp = jax.random.normal(keys[7], (NCLASS, OUT_CH), dtype=jnp.float32) * 0.1
    bp = 0.1 * jax.random.normal(keys[8], (NCLASS,), dtype=jnp.float32)

    out = head_forward(x, w0, gamma, beta, running_mean, running_var, w1, wp, bp)
    out = jax.block_until_ready(out)

    ref = _head_reference(x, w0, gamma, beta, running_mean, running_var, w1, wp, bp)
    # Tolerance covers MXU pass-precision / reassociation differences between
    # the fused kernel (BN-folded, projection fused) and the XLA reference.
    np.testing.assert_allclose(np.asarray(out), np.asarray(ref), rtol=1e-3, atol=1e-3)

    print("KERNEL_OK")
</pallas_src>

<mosaic_0001>
module attributes {stable_mosaic.version = 11 : i64} {
  func.func @_head_kernel(%arg0: i32, %arg1: i32, %arg2: memref<1x8x1024xf32, #tpu.memory_space<vmem>>, %arg3: memref<128x8xf32, #tpu.memory_space<vmem>>, %arg4: memref<128x1xf32, #tpu.memory_space<vmem>>, %arg5: memref<1x128x1xf32, #tpu.memory_space<vmem>>, %arg6: memref<8x128xf32, #tpu.memory_space<vmem>>, %arg7: memref<8x1xf32, #tpu.memory_space<vmem>>, %arg8: memref<1x8x1024xf32, #tpu.memory_space<vmem>>) attributes {dimension_semantics = [#tpu.dimension_semantics<parallel>, #tpu.dimension_semantics<parallel>], iteration_bounds = array<i64: 2, 4>, scalar_prefetch = 0 : i64, scratch_operands = 0 : i64, tpu.core_type = #tpu.core_type<tc>, window_params = [{transform_indices = @transform_0, window_bounds = array<i64: 1, 8, 1024>}, {pipeline_mode = #tpu.pipeline_mode<synchronous>, transform_indices = @transform_1, window_bounds = array<i64: 128, 8>}, {pipeline_mode = #tpu.pipeline_mode<synchronous>, transform_indices = @transform_2, window_bounds = array<i64: 128, 1>}, {transform_indices = @transform_3, window_bounds = array<i64: 1, 128, 1>}, {pipeline_mode = #tpu.pipeline_mode<synchronous>, transform_indices = @transform_4, window_bounds = array<i64: 8, 128>}, {pipeline_mode = #tpu.pipeline_mode<synchronous>, transform_indices = @transform_5, window_bounds = array<i64: 8, 1>}, {transform_indices = @transform_6, window_bounds = array<i64: 1, 8, 1024>}]} {
    %c0 = arith.constant 0 : index
    %c0_0 = arith.constant 0 : index
    %c0_1 = arith.constant 0 : index
    %0 = vector.load %arg2[%c0, %c0_0, %c0_1] : memref<1x8x1024xf32, #tpu.memory_space<vmem>>, vector<1x8x1024xf32>
    %1 = vector.shape_cast %0 : vector<1x8x1024xf32> to vector<8x1024xf32>
    %c0_2 = arith.constant 0 : index
    %c0_3 = arith.constant 0 : index
    %2 = vector.load %arg3[%c0_2, %c0_3] : memref<128x8xf32, #tpu.memory_space<vmem>>, vector<128x8xf32>
    %cst = arith.constant dense<0.000000e+00> : vector<128x1024xf32>
    %3 = tpu.matmul %2, %1, %cst {dimension_numbers = #tpu.dot_dimension_numbers<[1], [0], [0], [1], [0, 0, 1, 1], [], []>} : vector<128x8xf32>, vector<8x1024xf32>, vector<128x1024xf32> -> vector<128x1024xf32>
    %c0_4 = arith.constant 0 : index
    %c0_5 = arith.constant 0 : index
    %4 = vector.load %arg4[%c0_4, %c0_5] : memref<128x1xf32, #tpu.memory_space<vmem>>, vector<128x1xf32>
    %5 = vector.broadcast %4 : vector<128x1xf32> to vector<128x1024xf32>
    %6 = arith.addf %3, %5 : vector<128x1024xf32>
    %cst_6 = arith.constant 0.000000e+00 : f32
    %7 = vector.broadcast %cst_6 : f32 to vector<128x1024xf32>
    %8 = arith.maximumf %6, %7 : vector<128x1024xf32>
    %c0_7 = arith.constant 0 : index
    %c0_8 = arith.constant 0 : index
    %c0_9 = arith.constant 0 : index
    %9 = vector.load %arg5[%c0_7, %c0_8, %c0_9] : memref<1x128x1xf32, #tpu.memory_space<vmem>>, vector<1x128x1xf32>
    %10 = vector.shape_cast %9 : vector<1x128x1xf32> to vector<128x1xf32>
    %11 = vector.broadcast %10 : vector<128x1xf32> to vector<128x1024xf32>
    %12 = arith.mulf %8, %11 : vector<128x1024xf32>
    %c0_10 = arith.constant 0 : index
    %c0_11 = arith.constant 0 : index
    %13 = vector.load %arg6[%c0_10, %c0_11] : memref<8x128xf32, #tpu.memory_space<vmem>>, vector<8x128xf32>
    %cst_12 = arith.constant dense<0.000000e+00> : vector<8x1024xf32>
    %14 = tpu.matmul %13, %12, %cst_12 {dimension_numbers = #tpu.dot_dimension_numbers<[1], [0], [0], [1], [0, 0, 1, 1], [], []>} : vector<8x128xf32>, vector<128x1024xf32>, vector<8x1024xf32> -> vector<8x1024xf32>
    %c0_13 = arith.constant 0 : index
    %c0_14 = arith.constant 0 : index
    %15 = vector.load %arg7[%c0_13, %c0_14] : memref<8x1xf32, #tpu.memory_space<vmem>>, vector<8x1xf32>
    %16 = vector.broadcast %15 : vector<8x1xf32> to vector<8x1024xf32>
    %17 = arith.addf %14, %16 : vector<8x1024xf32>
    %c0_15 = arith.constant 0 : index
    %c0_16 = arith.constant 0 : index
    %c0_17 = arith.constant 0 : index
    %18 = vector.load %arg8[%c0_15, %c0_16, %c0_17] : memref<1x8x1024xf32, #tpu.memory_space<vmem>>, vector<1x8x1024xf32>
    %19 = vector.shape_cast %18 : vector<1x8x1024xf32> to vector<8x1024xf32>
    %20 = vector.shape_cast %17 : vector<8x1024xf32> to vector<1x8x1024xf32>
    tpu.vector_store %arg8[%c0_15, %c0_16, %c0_17], %20 {strides = array<i32>} : memref<1x8x1024xf32, #tpu.memory_space<vmem>>, vector<1x8x1024xf32>,
    return
  }
  func.func @transform_0(%arg0: i32, %arg1: i32) -> (i32, i32, i32) {
    %c0_i32 = arith.constant 0 : i32
    %c0_i32_0 = arith.constant 0 : i32
    return %arg0, %c0_i32, %arg1 : i32, i32, i32
  }
  func.func @transform_1(%arg0: i32, %arg1: i32) -> (i32, i32) {
    %c0_i32 = arith.constant 0 : i32
    %c0_i32_0 = arith.constant 0 : i32
    %c0_i32_1 = arith.constant 0 : i32
    return %c0_i32, %c0_i32_0 : i32, i32
  }
  func.func @transform_2(%arg0: i32, %arg1: i32) -> (i32, i32) {
    %c0_i32 = arith.constant 0 : i32
    %c0_i32_0 = arith.constant 0 : i32
    %c0_i32_1 = arith.constant 0 : i32
    return %c0_i32, %c0_i32_0 : i32, i32
  }
  func.func @transform_3(%arg0: i32, %arg1: i32) -> (i32, i32, i32) {
    %c0_i32 = arith.constant 0 : i32
    %c0_i32_0 = arith.constant 0 : i32
    %c0_i32_1 = arith.constant 0 : i32
    return %arg0, %c0_i32, %c0_i32_0 : i32, i32, i32
  }
  func.func @transform_4(%arg0: i32, %arg1: i32) -> (i32, i32) {
    %c0_i32 = arith.constant 0 : i32
    %c0_i32_0 = arith.constant 0 : i32
    %c0_i32_1 = arith.constant 0 : i32
    return %c0_i32, %c0_i32_0 : i32, i32
  }
  func.func @transform_5(%arg0: i32, %arg1: i32) -> (i32, i32) {
    %c0_i32 = arith.constant 0 : i32
    %c0_i32_0 = arith.constant 0 : i32
    %c0_i32_1 = arith.constant 0 : i32
    return %c0_i32, %c0_i32_0 : i32, i32
  }
  func.func @transform_6(%arg0: i32, %arg1: i32) -> (i32, i32, i32) {
    %c0_i32 = arith.constant 0 : i32
    %c0_i32_0 = arith.constant 0 : i32
    return %arg0, %c0_i32, %arg1 : i32, i32, i32
  }
}

</mosaic_0001>

<bundles_post_ra>
// kernel: head_forward.1
= control target key start
LH: loop header
LB: loop body
LE: loop exit
PB: predicated region body
PF: predicated region fallthrough
CT: control target
= control target key end

     0   :  { %s2206_s21 = smov 0   ;;  %s2208_s22 = smov 0   ;;  %s2945_s0 = inlined_call_operand.vmem [shape: f32[2,8,4096], index: 0, kind: input, shape index: {}]   ;;  %s2946_s1 = inlined_call_operand.vmem [shape: f32[128,8], index: 1, kind: input, shape index: {}]   ;;  %s2947_s2 = inlined_call_operand.vmem [shape: f32[128,1], index: 2, kind: input, shape index: {}]   ;;  %s2948_s3 = inlined_call_operand.vmem [shape: f32[2,128,1], index: 3, kind: input, shape index: {}]   ;;  %s2949_s4 = inlined_call_operand.vmem [shape: f32[8,128], index: 4, kind: input, shape index: {}]   ;;  %s2950_s5 = inlined_call_operand.vmem [shape: f32[8,1], index: 5, kind: input, shape index: {}]   ;;  %s2951_s6 = inlined_call_operand.vmem [shape: f32[2,8,4096], index: 6, kind: output, shape index: {}]  }
   0x1   :  { %s2210_s23 = smov 0   ;;  %s2212_s24 = smov 0  }
   0x2   :  { %s2214_s25 = smov 0  }
   0x3 LB: > { %s25_s26 = sadd.s32 1, %s2159_s23  ;;  %s28_s27 = sadd.s32 1, %s2163_s24  ;;  %s2167_s25 = sphi %s2214_s25, %s16_s25   ;;  %s2163_s24 = sphi %s2212_s24, %s2955_s24   ;;  %s2159_s23 = sphi %s2210_s23, %s2954_s23   ;;  %s2155_s22 = sphi %s2208_s22, %s2953_s22   ;;  %s2151_s21 = sphi %s2206_s21, %s2952_s21  }
   0x4   : > { %p26_p0 = scmp.ge.s32.totalorder %s25_s26, 4  ;;  %p1881_p1 = scmp.ge.s32.totalorder %s2167_s25, 1 }
   0x5   : > { %p243_p2 = scmp.lt.s32.totalorder %s2167_s25, 9 }
   0x6   : > { %s2957_s26 = smov (%p26_p0, %s25_s26), 0  ;;  %s2959_s27 = smov (!%p26_p0, %s28_s27), %s2163_s24 }
   0x7   : > { %p244_p3 = pnand %p1881_p1, %p243_p2  ;;  %p30_p4 = scmp.ge.s32.totalorder %s2959_s27, 2 }
   0x8   : > { %s1882_s28 = sshll.u32 (!%p244_p3), %s2151_s21, 3  ;;  %p287_p5 = scmp.lt.s32.totalorder (!%p244_p3), %s2155_s22, 1  ;;  %v2169_v0 = vmov (!%p244_p3), 0.0   ;;  %v2170_v1 = vmov (!%p244_p3), 0   ;;  %v335_v2 = vld [vmem:[%s2947_s2] sm:$0xff] (!%p244_p3)  ;;  %v337_v3 = vld [vmem:[%s2947_s2 + $0x10] sm:$0xff] (!%p244_p3) }
   0x9   : > { %s2961_s27 = smov (%p30_p4, %s2959_s27), 0  ;;  %247 = sbr.rel (%p244_p3) target bundleno = 589 (0x24d), region = 44 }
   0xa   : > { %p289_p6 = scmp.lt.s32.totalorder (!%p244_p3), %s1882_s28, 31  ;;  %544 = vmatprep.mubr.f32.mxu0 (!%p244_p3), %v2169_v0  ;;  %705 = vmatprep.mubr.f32.mxu1 (!%p244_p3), %v2169_v0  ;;  %v2258_v4 = vld [vmem:[%s2946_s1] sm:$0xff] (!%p244_p3)  ;;  %vm431_vm0 = vcmask (!%p244_p3), 64512   ;;  %v2268_v13 = vld [vmem:[%s2946_s1 + $0x8] sm:$0xff] (!%p244_p3)  ;;  %v338_v15 = vld [vmem:[%s2947_s2 + $0x18] sm:$0xff] (!%p244_p3) }
   0xb   : > { %2127 = vset.pattern.permute.xlu0 (!%p244_p3), %v2170_v1  ;;  %2128 = vset.pattern.permute.xlu1 (!%p244_p3), %v2170_v1  ;;  %v336_v14 = vld [vmem:[%s2947_s2 + $0x8] sm:$0xff] (!%p244_p3)  ;;  %v2292_v16 = vld [vmem:[%s2946_s1 + $0x10] sm:$0xff] (!%p244_p3)  ;;  %v2305_v19 = vld [vmem:[%s2946_s1 + $0x18] sm:$0xff] (!%p244_p3) }
   0xc   : > { %353 = vperm.xlu0 (!%p244_p3), %2127, %v335_v2   ;;  %363 = vperm.xlu1 (!%p244_p3), %2128, %v337_v3   ;;  %v339_v20 = vld [vmem:[%s2947_s2 + $0x20] sm:$0xff] (!%p244_p3)  ;;  %v340_v21 = vld [vmem:[%s2947_s2 + $0x28] sm:$0xff] (!%p244_p3)  ;;  %v341_v26 = vld [vmem:[%s2947_s2 + $0x30] sm:$0xff] (!%p244_p3) }
   0xd   : > { %v2322_v22 = vld [vmem:[%s2946_s1 + $0x20] sm:$0xff] (!%p244_p3)  ;;  %v2335_v25 = vld [vmem:[%s2946_s1 + $0x28] sm:$0xff] (!%p244_p3)  ;;  %v342_v27 = vld [vmem:[%s2947_s2 + $0x38] sm:$0xff] (!%p244_p3) }
   0xe   : > { %v2352_v28 = vld [vmem:[%s2946_s1 + $0x30] sm:$0xff] (!%p244_p3)  ;;  %v2365_v31 = vld [vmem:[%s2946_s1 + $0x38] sm:$0xff] (!%p244_p3)  ;;  %v343_v32 = vld [vmem:[%s2947_s2 + $0x40] sm:$0xff] (!%p244_p3) }
   0xf   : > { %v344_v33 = vld [vmem:[%s2947_s2 + $0x48] sm:$0xff] (!%p244_p3)  ;;  %v2382_v34 = vld [vmem:[%s2946_s1 + $0x40] sm:$0xff] (!%p244_p3)  ;;  %v345_v38 = vld [vmem:[%s2947_s2 + $0x50] sm:$0xff] (!%p244_p3) }
  0x10   : > { %s2963_s22 = smov (!%p287_p5, %s2155_s22), 1  ;;  %s2965_s28 = smov (!%p289_p6, %s1882_s28), 31  ;;  %358 = vperm.xlu0 %2127, %v336_v14   ;;  %368 = vperm.xlu1 %2128, %v338_v15   ;;  %v2395_v37 = vld [vmem:[%s2946_s1 + $0x48] sm:$0xff]  ;;  %v346_v39 = vld [vmem:[%s2947_s2 + $0x58] sm:$0xff]  ;;  %v2412_v40 = vld [vmem:[%s2946_s1 + $0x50] sm:$0xff] }
  0x11   : > { %s1883_s29 = sshll.u32 %s2963_s22, 5  ;;  %s1956_s17 = sshll.u32 %s2963_s22, 7  ;;  %v2425_v43 = vld [vmem:[%s2946_s1 + $0x58] sm:$0xff]  ;;  %v347_v44 = vld [vmem:[%s2947_s2 + $0x60] sm:$0xff]  ;;  %v348_v45 = vld [vmem:[%s2947_s2 + $0x68] sm:$0xff] }
  0x12   : > { %s2244_s8 = sadd.s32 %s1883_s29, %s2965_s28  ;;  %s2281_s7 = scalar_lea.vmem %s2948_s3, %s1956_s17  ;;  %v2442_v46 = vld [vmem:[%s2946_s1 + $0x60] sm:$0xff]  ;;  %v2455_v49 = vld [vmem:[%s2946_s1 + $0x68] sm:$0xff]  ;;  %v349_v50 = vld [vmem:[%s2947_s2 + $0x70] sm:$0xff] }
  0x13   : > { %s1884_s11 = sshll.u32 %s2244_s8, 3  ;;  %v1252_v17 = vld [vmem:[%s2281_s7] sm:$0xff]  ;;  %v1253_v18 = vld [vmem:[%s2281_s7 + $0x8] sm:$0xff]  ;;  %v1254_v23 = vld [vmem:[%s2281_s7 + $0x10] sm:$0xff] }
  0x14   : > { %s294_s14 = scalar_lea.vmem %s2945_s0, %s1884_s11  ;;  %1270 = vperm.xlu0 %2127, %v1252_v17   ;;  %1275 = vperm.xlu1 %2128, %v1253_v18   ;;  %v1255_v24 = vld [vmem:[%s2281_s7 + $0x18] sm:$0xff]  ;;  %v1256_v29 = vld [vmem:[%s2281_s7 + $0x20] sm:$0xff]  ;;  %v1257_v30 = vld [vmem:[%s2281_s7 + $0x28] sm:$0xff]  ;;  %s309_s19 = scalar_lea.vmem %s2951_s6, %s1884_s11 }
  0x15   : > { %v312_v5 = vld [vmem:[%s294_s14 + $0x8] sm:$0xff]  ;;  %v314_v6 = vld [vmem:[%s294_s14 + $0x18] sm:$0xff]  ;;  %v311_v7 = vld [vmem:[%s294_s14] sm:$0xff] }
  0x16   : > { %480 = vmatprep.subr.mxu0 %v312_v5  ;;  %641 = vmatprep.subr.mxu1 %v314_v6  ;;  %v313_v8 = vld [vmem:[%s294_s14 + $0x10] sm:$0xff]  ;;  %v316_v9 = vld [vmem:[%s294_s14 + $0x28] sm:$0xff]  ;;  %v318_v10 = vld [vmem:[%s294_s14 + $0x38] sm:$0xff] }
  0x17   : > { %481 = vmatpush1.msra.mxu0 %v311_v7  ;;  %642 = vmatpush1.msra.mxu1 %v313_v8  ;;  %v315_v11 = vld [vmem:[%s294_s14 + $0x20] sm:$0xff]  ;;  %v317_v12 = vld [vmem:[%s294_s14 + $0x30] sm:$0xff]  ;;  %v1259_v36 = vld [vmem:[%s2281_s7 + $0x38] sm:$0xff] }
  0x18   : > { %1890 = vmatmul.mubr.msk.f32.vlgmr.msra.gmra.mrb[0].mxu0 %vm431_vm0, %v2258_v4  ;;  %1906 = vmatmul.mubr.msk.f32.vlgmr.msra.gmra.mrb[0].mxu1 %vm431_vm0, %v2258_v4  ;;  %v1258_v35 = vld [vmem:[%s2281_s7 + $0x30] sm:$0xff]  ;;  %v1260_v41 = vld [vmem:[%s2281_s7 + $0x40] sm:$0xff]  ;;  %v1261_v42 = vld [vmem:[%s2281_s7 + $0x48] sm:$0xff] }
  0x19   : > { %802 = vmatprep.subr.mxu0 %v316_v9  ;;  %963 = vmatprep.subr.mxu1 %v318_v10  ;;  %v1262_v47 = vld [vmem:[%s2281_s7 + $0x50] sm:$0xff]  ;;  %v1263_v48 = vld [vmem:[%s2281_s7 + $0x58] sm:$0xff]  ;;  %v1264_v53 = vld [vmem:[%s2281_s7 + $0x60] sm:$0xff] }
  0x1a   : > { %803 = vmatpush1.msra.mxu0 %v315_v11  ;;  %964 = vmatpush1.msra.mxu1 %v317_v12  ;;  %v350_v51 = vld [vmem:[%s2947_s2 + $0x78] sm:$0xff]  ;;  %v2472_v52 = vld [vmem:[%s2946_s1 + $0x70] sm:$0xff]  ;;  %v1265_v54 = vld [vmem:[%s2281_s7 + $0x68] sm:$0xff] }
  0x1b   : > { %550 = vmatprep.mubr.f32.mxu0 %v2169_v0  ;;  %711 = vmatprep.mubr.f32.mxu1 %v2169_v0  ;;  %v2485_v55 = vld [vmem:[%s2946_s1 + $0x78] sm:$0xff]  ;;  %v1266_v56 = vld [vmem:[%s2281_s7 + $0x70] sm:$0xff]  ;;  %v1477_v58 = vld [vmem:[%s2950_s5] sm:$0xff] }
  0x1c   : > { %1891 = vmatmul.mubr.msk.f32.gmra.mrb[2].mxu0 %vm431_vm0, %v2268_v13  ;;  %1907 = vmatmul.mubr.msk.f32.gmra.mrb[2].mxu1 %vm431_vm0, %v2268_v13  ;;  %v1267_v57 = vld [vmem:[%s2281_s7 + $0x78] sm:$0xff] }
  0x1d   : > { %556 = vmatprep.mubr.f32.mxu0 %v2169_v0  ;;  %717 = vmatprep.mubr.f32.mxu1 %v2169_v0 }
  0x1e   : > { %373 = vperm.xlu0 %2127, %v339_v20   ;;  %378 = vperm.xlu1 %2128, %v340_v21  }
  0x20   : > { %1892 = vmatmul.mubr.msk.f32.gmra.mrb[4].mxu0 %vm431_vm0, %v2292_v16  ;;  %1908 = vmatmul.mubr.msk.f32.gmra.mrb[4].mxu1 %vm431_vm0, %v2292_v16 }
  0x21   : > { %562 = vmatprep.mubr.f32.mxu0 %v2169_v0  ;;  %723 = vmatprep.mubr.f32.mxu1 %v2169_v0 }
  0x22   : > { %1280 = vperm.xlu0 %2127, %v1254_v23   ;;  %1285 = vperm.xlu1 %2128, %v1255_v24  }
  0x24   : > { %1893 = vmatmul.mubr.msk.f32.gmra.mrb[6].mxu0 %vm431_vm0, %v2305_v19  ;;  %1909 = vmatmul.mubr.msk.f32.gmra.mrb[6].mxu1 %vm431_vm0, %v2305_v19 }
  0x25   : > { %568 = vmatprep.mubr.f32.mxu0 %v2169_v0  ;;  %729 = vmatprep.mubr.f32.mxu1 %v2169_v0 }
  0x26   : > { %383 = vperm.xlu0 %2127, %v341_v26   ;;  %388 = vperm.xlu1 %2128, %v342_v27  }
  0x28   : > { %1894 = vmatmul.mubr.msk.f32.gmra.mrb[8].mxu0 %vm431_vm0, %v2322_v22  ;;  %1910 = vmatmul.mubr.msk.f32.gmra.mrb[8].mxu1 %vm431_vm0, %v2322_v22 }
  0x29   : > { %574 = vmatprep.mubr.f32.mxu0 %v2169_v0  ;;  %735 = vmatprep.mubr.f32.mxu1 %v2169_v0 }
  0x2a   : > { %1290 = vperm.xlu0 %2127, %v1256_v29   ;;  %1295 = vperm.xlu1 %2128, %v1257_v30  }
  0x2c   : > { %1895 = vmatmul.mubr.msk.f32.gmra.mrb[10].mxu0 %vm431_vm0, %v2335_v25  ;;  %1911 = vmatmul.mubr.msk.f32.gmra.mrb[10].mxu1 %vm431_vm0, %v2335_v25 }
  0x2d   : > { %580 = vmatprep.mubr.f32.mxu0 %v2169_v0  ;;  %741 = vmatprep.mubr.f32.mxu1 %v2169_v0 }
  0x2e   : > { %393 = vperm.xlu0 %2127, %v343_v32   ;;  %398 = vperm.xlu1 %2128, %v344_v33  }
  0x30   : > { %1896 = vmatmul.mubr.msk.f32.gmra.mrb[12].mxu0 %vm431_vm0, %v2352_v28  ;;  %1912 = vmatmul.mubr.msk.f32.gmra.mrb[12].mxu1 %vm431_vm0, %v2352_v28 }
  0x31   : > { %586 = vmatprep.mubr.f32.mxu0 %v2169_v0  ;;  %747 = vmatprep.mubr.f32.mxu1 %v2169_v0 }
  0x32   : > { %1300 = vperm.xlu0 %2127, %v1258_v35   ;;  %1305 = vperm.xlu1 %2128, %v1259_v36  }
  0x34   : > { %1897 = vmatmul.mubr.msk.f32.gmra.mrb[14].mxu0 %vm431_vm0, %v2365_v31  ;;  %1913 = vmatmul.mubr.msk.f32.gmra.mrb[14].mxu1 %vm431_vm0, %v2365_v31 }
  0x35   : > { %592 = vmatprep.mubr.f32.mxu0 %v2169_v0  ;;  %753 = vmatprep.mubr.f32.mxu1 %v2169_v0 }
  0x36   : > { %403 = vperm.xlu0 %2127, %v345_v38   ;;  %408 = vperm.xlu1 %2128, %v346_v39  }
  0x38   : > { %1898 = vmatmul.mubr.msk.f32.gmra.mrb[16].mxu0 %vm431_vm0, %v2382_v34  ;;  %1914 = vmatmul.mubr.msk.f32.gmra.mrb[16].mxu1 %vm431_vm0, %v2382_v34 }
  0x39   : > { %598 = vmatprep.mubr.f32.mxu0 %v2169_v0  ;;  %759 = vmatprep.mubr.f32.mxu1 %v2169_v0 }
  0x3a   : > { %1310 = vperm.xlu0 %2127, %v1260_v41   ;;  %1315 = vperm.xlu1 %2128, %v1261_v42  }
  0x3c   : > { %1899 = vmatmul.mubr.msk.f32.gmra.mrb[18].mxu0 %vm431_vm0, %v2395_v37  ;;  %1915 = vmatmul.mubr.msk.f32.gmra.mrb[18].mxu1 %vm431_vm0, %v2395_v37 }
  0x3d   : > { %604 = vmatprep.mubr.f32.mxu0 %v2169_v0  ;;  %765 = vmatprep.mubr.f32.mxu1 %v2169_v0 }
  0x3e   : > { %413 = vperm.xlu0 %2127, %v347_v44   ;;  %418 = vperm.xlu1 %2128, %v348_v45  }
  0x40   : > { %1900 = vmatmul.mubr.msk.f32.gmra.mrb[20].mxu0 %vm431_vm0, %v2412_v40  ;;  %1916 = vmatmul.mubr.msk.f32.gmra.mrb[20].mxu1 %vm431_vm0, %v2412_v40 }
  0x41   : > { %610 = vmatprep.mubr.f32.mxu0 %v2169_v0  ;;  %771 = vmatprep.mubr.f32.mxu1 %v2169_v0 }
  0x42   : > { %1320 = vperm.xlu0 %2127, %v1262_v47   ;;  %1325 = vperm.xlu1 %2128, %v1263_v48  }
  0x44   : > { %1901 = vmatmul.mubr.msk.f32.gmra.mrb[22].mxu0 %vm431_vm0, %v2425_v43  ;;  %1917 = vmatmul.mubr.msk.f32.gmra.mrb[22].mxu1 %vm431_vm0, %v2425_v43 }
  0x45   : > { %616 = vmatprep.mubr.f32.mxu0 %v2169_v0  ;;  %777 = vmatprep.mubr.f32.mxu1 %v2169_v0 }
  0x46   : > { %423 = vperm.xlu0 %2127, %v349_v50   ;;  %428 = vperm.xlu1 %2128, %v350_v51  }
  0x48   : > { %1902 = vmatmul.mubr.msk.f32.gmra.mrb[24].mxu0 %vm431_vm0, %v2442_v46  ;;  %1918 = vmatmul.mubr.msk.f32.gmra.mrb[24].mxu1 %vm431_vm0, %v2442_v46 }
  0x49   : > { %622 = vmatprep.mubr.f32.mxu0 %v2169_v0  ;;  %783 = vmatprep.mubr.f32.mxu1 %v2169_v0 }
  0x4a   : > { %1330 = vperm.xlu0 %2127, %v1264_v53   ;;  %1335 = vperm.xlu1 %2128, %v1265_v54  }
  0x4c   : > { %1903 = vmatmul.mubr.msk.f32.gmra.mrb[26].mxu0 %vm431_vm0, %v2455_v49  ;;  %1919 = vmatmul.mubr.msk.f32.gmra.mrb[26].mxu1 %vm431_vm0, %v2455_v49 }
  0x4d   : > { %628 = vmatprep.mubr.f32.mxu0 %v2169_v0  ;;  %789 = vmatprep.mubr.f32.mxu1 %v2169_v0 }
  0x4e   : > { %1340 = vperm.xlu0 %2127, %v1266_v56   ;;  %1345 = vperm.xlu1 %2128, %v1267_v57  }
  0x50   : > { %1904 = vmatmul.mubr.msk.f32.gmra.mrb[28].mxu0 %vm431_vm0, %v2472_v52  ;;  %1920 = vmatmul.mubr.msk.f32.gmra.mrb[28].mxu1 %vm431_vm0, %v2472_v52 }
  0x51   : > { %634 = vmatprep.mubr.f32.mxu0 %v2169_v0  ;;  %795 = vmatprep.mubr.f32.mxu1 %v2169_v0 }
  0x52   : > { %1480 = vperm.xlu0 %2127, %v1477_v58  }
  0x54   : > { %1905 = vmatmul.mubr.msk.f32.gmra.mrb[30].mxu0 %vm431_vm0, %v2485_v55  ;;  %1921 = vmatmul.mubr.msk.f32.gmra.mrb[30].mxu1 %vm431_vm0, %v2485_v55 }
  0x55   : > { %866 = vmatprep.mubr.f32.mxu0 %v2169_v0  ;;  %1027 = vmatprep.mubr.f32.mxu1 %v2169_v0 }
  0x58   : > { %1922 = vmatmul.mubr.msk.f32.vlgmr.msra.gmra.mrb[32].mxu0 %vm431_vm0, %v2258_v4  ;;  %1938 = vmatmul.mubr.msk.f32.vlgmr.msra.gmra.mrb[32].mxu1 %vm431_vm0, %v2258_v4 }
  0x59   : > { %872 = vmatprep.mubr.f32.mxu0 %v2169_v0  ;;  %1033 = vmatprep.mubr.f32.mxu1 %v2169_v0 }
  0x5c   : > { %1923 = vmatmul.mubr.msk.f32.gmra.mrb[34].mxu0 %vm431_vm0, %v2268_v13  ;;  %1939 = vmatmul.mubr.msk.f32.gmra.mrb[34].mxu1 %vm431_vm0, %v2268_v13 }
  0x5d   : > { %878 = vmatprep.mubr.f32.mxu0 %v2169_v0  ;;  %1039 = vmatprep.mubr.f32.mxu1 %v2169_v0 }
  0x60   : > { %1924 = vmatmul.mubr.msk.f32.gmra.mrb[36].mxu0 %vm431_vm0, %v2292_v16  ;;  %1940 = vmatmul.mubr.msk.f32.gmra.mrb[36].mxu1 %vm431_vm0, %v2292_v16 }
  0x61   : > { %884 = vmatprep.mubr.f32.mxu0 %v2169_v0  ;;  %1045 = vmatprep.mubr.f32.mxu1 %v2169_v0 }
  0x64   : > { %1925 = vmatmul.mubr.msk.f32.gmra.mrb[38].mxu0 %vm431_vm0, %v2305_v19  ;;  %1941 = vmatmul.mubr.msk.f32.gmra.mrb[38].mxu1 %vm431_vm0, %v2305_v19 }
  0x65   : > { %890 = vmatprep.mubr.f32.mxu0 %v2169_v0  ;;  %1051 = vmatprep.mubr.f32.mxu1 %v2169_v0 }
  0x68   : > { %1926 = vmatmul.mubr.msk.f32.gmra.mrb[40].mxu0 %vm431_vm0, %v2322_v22  ;;  %1942 = vmatmul.mubr.msk.f32.gmra.mrb[40].mxu1 %vm431_vm0, %v2322_v22 }
  0x69   : > { %896 = vmatprep.mubr.f32.mxu0 %v2169_v0  ;;  %1057 = vmatprep.mubr.f32.mxu1 %v2169_v0 }
  0x6c   : > { %1927 = vmatmul.mubr.msk.f32.gmra.mrb[42].mxu0 %vm431_vm0, %v2335_v25  ;;  %1943 = vmatmul.mubr.msk.f32.gmra.mrb[42].mxu1 %vm431_vm0, %v2335_v25 }
  0x6d   : > { %902 = vmatprep.mubr.f32.mxu0 %v2169_v0  ;;  %1063 = vmatprep.mubr.f32.mxu1 %v2169_v0 }
  0x70   : > { %1928 = vmatmul.mubr.msk.f32.gmra.mrb[44].mxu0 %vm431_vm0, %v2352_v28  ;;  %1944 = vmatmul.mubr.msk.f32.gmra.mrb[44].mxu1 %vm431_vm0, %v2352_v28 }
  0x71   : > { %908 = vmatprep.mubr.f32.mxu0 %v2169_v0  ;;  %1069 = vmatprep.mubr.f32.mxu1 %v2169_v0 }
  0x74   : > { %1929 = vmatmul.mubr.msk.f32.gmra.mrb[46].mxu0 %vm431_vm0, %v2365_v31  ;;  %1945 = vmatmul.mubr.msk.f32.gmra.mrb[46].mxu1 %vm431_vm0, %v2365_v31 }
  0x75   : > { %914 = vmatprep.mubr.f32.mxu0 %v2169_v0  ;;  %1075 = vmatprep.mubr.f32.mxu1 %v2169_v0 }
  0x78   : > { %1930 = vmatmul.mubr.msk.f32.gmra.mrb[48].mxu0 %vm431_vm0, %v2382_v34  ;;  %1946 = vmatmul.mubr.msk.f32.gmra.mrb[48].mxu1 %vm431_vm0, %v2382_v34 }
  0x79   : > { %920 = vmatprep.mubr.f32.mxu0 %v2169_v0  ;;  %1081 = vmatprep.mubr.f32.mxu1 %v2169_v0 }
  0x7c   : > { %1931 = vmatmul.mubr.msk.f32.gmra.mrb[50].mxu0 %vm431_vm0, %v2395_v37  ;;  %1947 = vmatmul.mubr.msk.f32.gmra.mrb[50].mxu1 %vm431_vm0, %v2395_v37 }
  0x7d   : > { %926 = vmatprep.mubr.f32.mxu0 %v2169_v0  ;;  %1087 = vmatprep.mubr.f32.mxu1 %v2169_v0 }
  0x80   : > { %1932 = vmatmul.mubr.msk.f32.gmra.mrb[52].mxu0 %vm431_vm0, %v2412_v40  ;;  %1948 = vmatmul.mubr.msk.f32.gmra.mrb[52].mxu1 %vm431_vm0, %v2412_v40 }
  0x81   : > { %932 = vmatprep.mubr.f32.mxu0 %v2169_v0  ;;  %1093 = vmatprep.mubr.f32.mxu1 %v2169_v0 }
  0x84   : > { %1933 = vmatmul.mubr.msk.f32.gmra.mrb[54].mxu0 %vm431_vm0, %v2425_v43  ;;  %1949 = vmatmul.mubr.msk.f32.gmra.mrb[54].mxu1 %vm431_vm0, %v2425_v43 }
  0x85   : > { %938 = vmatprep.mubr.f32.mxu0 %v2169_v0  ;;  %1099 = vmatprep.mubr.f32.mxu1 %v2169_v0 }
  0x88   : > { %1934 = vmatmul.mubr.msk.f32.gmra.mrb[56].mxu0 %vm431_vm0, %v2442_v46  ;;  %1950 = vmatmul.mubr.msk.f32.gmra.mrb[56].mxu1 %vm431_vm0, %v2442_v46 }
  0x89   : > { %944 = vmatprep.mubr.f32.mxu0 %v2169_v0  ;;  %1105 = vmatprep.mubr.f32.mxu1 %v2169_v0 }
  0x8b   : > { %v2594_v59 = vpop.permute.xlu0 %353  ;;  %v2596_v60 = vpop.permute.xlu1 %363 }
  0x8c   : > { %1935 = vmatmul.mubr.msk.f32.gmra.mrb[58].mxu0 %vm431_vm0, %v2455_v49  ;;  %1951 = vmatmul.mubr.msk.f32.gmra.mrb[58].mxu1 %vm431_vm0, %v2455_v49 }
  0x8d   : > { %950 = vmatprep.mubr.f32.mxu0 %v2169_v0  ;;  %1111 = vmatprep.mubr.f32.mxu1 %v2169_v0 }
  0x8f   : > { %v2598_v61 = vpop.permute.xlu0 %358  ;;  %v2600_v62 = vpop.permute.xlu1 %368 }
  0x90   : > { %1936 = vmatmul.mubr.msk.f32.gmra.mrb[60].mxu0 %vm431_vm0, %v2472_v52  ;;  %1952 = vmatmul.mubr.msk.f32.gmra.mrb[60].mxu1 %vm431_vm0, %v2472_v52 }
  0x91   : > { %956 = vmatprep.mubr.f32.mxu0 %v2169_v0  ;;  %1117 = vmatprep.mubr.f32.mxu1 %v2169_v0 }
  0x93   : > { %v2602_v63 = vpop.permute.xlu0 %1270  ;;  %v2604_v1 = vpop.permute.xlu1 %1275 }
  0x94   : > { %1937 = vmatmul.mubr.msk.f32.gmra.mrb[62].mxu0 %vm431_vm0, %v2485_v55  ;;  %1953 = vmatmul.mubr.msk.f32.gmra.mrb[62].mxu1 %vm431_vm0, %v2485_v55 }
  0x95   : > { %1547 = vmatprep.mubr.f32.mxu0 %v2169_v0  ;;  %1618 = vmatprep.mubr.f32.mxu1 %v2169_v0 }
  0x9d   : > { %v2606_v2 = vpop.permute.xlu0 %373  ;;  %v2608_v3 = vpop.permute.xlu1 %378 }
  0xa1   : > { %v2610_v4 = vpop.permute.xlu0 %1280  ;;  %v2612_v5 = vpop.permute.xlu1 %1285 }
  0xa5   : > { %v2614_v6 = vpop.permute.xlu0 %383  ;;  %v2616_v7 = vpop.permute.xlu1 %388 }
  0xa9   : > { %v2618_v8 = vpop.permute.xlu0 %1290  ;;  %v2620_v9 = vpop.permute.xlu1 %1295 }
  0xad   : > { %v2622_v10 = vpop.permute.xlu0 %393  ;;  %v2624_v11 = vpop.permute.xlu1 %398 }
  0xb1   : > { %v2634_v32 = vpop.permute.xlu0 %1300  ;;  %v2638_v35 = vpop.permute.xlu1 %1305 }
  0xeb   : > { %v546_v12 = vpop.f32.mrb[0].mxu0  ;;  %v707_v13 = vpop.f32.mrb[0].mxu1 }
  0xec   : > { %v547_v14 = vadd.f32 %v546_v12, %v2594_v59  ;;  %v708_v15 = vadd.f32 %v707_v13, %v2594_v59  ;;  %v548_v16 = vpop.f32.mrb[1].mxu0  ;;  %v709_v17 = vpop.f32.mrb[1].mxu1 }
  0xed   : > { %v549_v18 = vadd.f32 %v548_v16, %v2594_v59  ;;  %v710_v19 = vadd.f32 %v709_v17, %v2594_v59 }
  0xee   : > { %v1124_v20 = vmax.f32 %v547_v14, 0.0  ;;  %v1126_v21 = vmax.f32 %v708_v15, 0.0 }
  0xef   : > { %v1125_v22 = vmax.f32 %v549_v18, 0.0  ;;  %v1127_v23 = vmax.f32 %v710_v19, 0.0  ;;  %v552_v24 = vpop.f32.mrb[2].mxu0  ;;  %v713_v25 = vpop.f32.mrb[2].mxu1 }
  0xf0   : > { %v553_v26 = vadd.f32 %v552_v24, %v2598_v61  ;;  %v714_v27 = vadd.f32 %v713_v25, %v2598_v61  ;;  %v554_v28 = vpop.f32.mrb[3].mxu0  ;;  %v715_v29 = vpop.f32.mrb[3].mxu1  ;;  %v1348_v33 = vmul.f32 %v2602_v63, %v1124_v20  ;;  %v1350_v34 = vmul.f32 %v2602_v63, %v1126_v21 }
  0xf1   : > { %v555_v30 = vadd.f32 %v554_v28, %v2598_v61  ;;  %v716_v31 = vadd.f32 %v715_v29, %v2598_v61  ;;  %v1349_v38 = vmul.f32 %v2602_v63, %v1125_v22  ;;  %v1351_v39 = vmul.f32 %v2602_v63, %v1127_v23  ;;  %v2654_v23 = vpop.permute.xlu0 %403  ;;  %v2656_v24 = vpop.permute.xlu1 %408 }
  0xf2   : > { %v1132_v36 = vmax.f32 %v553_v26, 0.0  ;;  %v1134_v37 = vmax.f32 %v714_v27, 0.0 }
  0xf3   : > { %v1133_v40 = vmax.f32 %v555_v30, 0.0  ;;  %v1135_v41 = vmax.f32 %v716_v31, 0.0  ;;  %v558_v42 = vpop.f32.mrb[4].mxu0  ;;  %v719_v43 = vpop.f32.mrb[4].mxu1 }
  0xf4   : > { %v1356_v44 = vmul.f32 %v2604_v1, %v1132_v36  ;;  %v1358_v45 = vmul.f32 %v2604_v1, %v1134_v37  ;;  %v559_v46 = vadd.f32 %v558_v42, %v2596_v60  ;;  %v720_v47 = vadd.f32 %v719_v43, %v2596_v60  ;;  %v560_v48 = vpop.f32.mrb[5].mxu0  ;;  %v721_v49 = vpop.f32.mrb[5].mxu1 }
  0xf5   : > { %v1357_v50 = vmul.f32 %v2604_v1, %v1133_v40  ;;  %v1359_v51 = vmul.f32 %v2604_v1, %v1135_v41  ;;  %v561_v52 = vadd.f32 %v560_v48, %v2596_v60  ;;  %v722_v53 = vadd.f32 %v721_v49, %v2596_v60 }
  0xf6   : > { %v1959_v54 = vpack.c.bf16 %v1356_v44, %v1348_v33  ;;  %v1991_v55 = vpack.c.bf16 %v1358_v45, %v1350_v34  ;;  %v1140_v56 = vmax.f32 %v559_v46, 0.0  ;;  %v1142_v57 = vmax.f32 %v720_v47, 0.0 }
  0xf7   : > { %v1141_v58 = vmax.f32 %v561_v52, 0.0  ;;  %v1143_v12 = vmax.f32 %v722_v53, 0.0  ;;  %v564_v13 = vpop.f32.mrb[6].mxu0  ;;  %v725_v14 = vpop.f32.mrb[6].mxu1  ;;  %v1957_v15 = vpack.c.bf16 %v1357_v50, %v1349_v38  ;;  %v1989_v16 = vpack.c.bf16 %v1359_v51, %v1351_v39 }
  0xf8   : > { %v565_v17 = vadd.f32 %v564_v13, %v2600_v62  ;;  %v726_v18 = vadd.f32 %v725_v14, %v2600_v62  ;;  %v566_v19 = vpop.f32.mrb[7].mxu0  ;;  %v727_v20 = vpop.f32.mrb[7].mxu1  ;;  %v1364_v25 = vmul.f32 %v2610_v4, %v1140_v56  ;;  %v1366_v26 = vmul.f32 %v2610_v4, %v1142_v57 }
  0xf9   : > { %v567_v21 = vadd.f32 %v566_v19, %v2600_v62  ;;  %v728_v22 = vadd.f32 %v727_v20, %v2600_v62  ;;  %1958 = vmatprep.subr.bf16.mxu0 %v1957_v15  ;;  %1990 = vmatprep.subr.bf16.mxu1 %v1989_v16  ;;  %v1365_v29 = vmul.f32 %v2610_v4, %v1141_v58  ;;  %v2674_v16 = vpop.permute.xlu0 %1310 }
  0xfa   : > { %v1148_v27 = vmax.f32 %v565_v17, 0.0  ;;  %v1150_v28 = vmax.f32 %v726_v18, 0.0  ;;  %1960 = vmatpush1.bf16.msra.mxu0 %v1959_v54  ;;  %v1367_v30 = vmul.f32 %v2610_v4, %v1143_v12  ;;  %1992 = vmatpush1.bf16.msra.mxu1 %v1991_v55  ;;  %v2676_v17 = vpop.permute.xlu1 %1315 }
  0xfb   : > { %v1149_v31 = vmax.f32 %v567_v21, 0.0  ;;  %v1151_v33 = vmax.f32 %v728_v22, 0.0  ;;  %v570_v34 = vpop.f32.mrb[8].mxu0  ;;  %v731_v36 = vpop.f32.mrb[8].mxu1 }
  0xfc   : > { %v1372_v37 = vmul.f32 %v2612_v5, %v1148_v27  ;;  %v1374_v38 = vmul.f32 %v2612_v5, %v1150_v28  ;;  %v571_v39 = vadd.f32 %v570_v34, %v2606_v2  ;;  %v732_v40 = vadd.f32 %v731_v36, %v2606_v2  ;;  %v572_v41 = vpop.f32.mrb[9].mxu0  ;;  %v733_v42 = vpop.f32.mrb[9].mxu1 }
  0xfd   : > { %v1373_v43 = vmul.f32 %v2612_v5, %v1149_v31  ;;  %v1375_v44 = vmul.f32 %v2612_v5, %v1151_v33  ;;  %v573_v45 = vadd.f32 %v572_v41, %v2606_v2  ;;  %v734_v46 = vadd.f32 %v733_v42, %v2606_v2 }
  0xfe   : > { %v1963_v47 = vpack.c.bf16 %v1372_v37, %v1364_v25  ;;  %v1995_v48 = vpack.c.bf16 %v1374_v38, %v1366_v26  ;;  %v1156_v49 = vmax.f32 %v571_v39, 0.0  ;;  %v1158_v50 = vmax.f32 %v732_v40, 0.0 }
  0xff   : > { %v1157_v51 = vmax.f32 %v573_v45, 0.0  ;;  %v1159_v52 = vmax.f32 %v734_v46, 0.0  ;;  %v576_v53 = vpop.f32.mrb[10].mxu0  ;;  %v737_v54 = vpop.f32.mrb[10].mxu1  ;;  %v1961_v55 = vpack.c.bf16 %v1373_v43, %v1365_v29  ;;  %v1993_v56 = vpack.c.bf16 %v1375_v44, %v1367_v30 }
 0x100   : > { %v577_v57 = vadd.f32 %v576_v53, %v2608_v3  ;;  %v738_v58 = vadd.f32 %v737_v54, %v2608_v3  ;;  %v578_v12 = vpop.f32.mrb[11].mxu0  ;;  %v739_v13 = vpop.f32.mrb[11].mxu1  ;;  %v1380_v18 = vmul.f32 %v2618_v8, %v1156_v49  ;;  %v1382_v19 = vmul.f32 %v2618_v8, %v1158_v50 }
 0x101   : > { %v579_v14 = vadd.f32 %v578_v12, %v2608_v3  ;;  %v740_v15 = vadd.f32 %v739_v13, %v2608_v3  ;;  %1962 = vmatprep.subr.bf16.mxu0 %v1961_v55  ;;  %1994 = vmatprep.subr.bf16.mxu1 %v1993_v56  ;;  %v1381_v22 = vmul.f32 %v2618_v8, %v1157_v51  ;;  %v2696_v12 = vpop.permute.xlu1 %418 }
 0x102   : > { %v1164_v20 = vmax.f32 %v577_v57, 0.0  ;;  %v1166_v21 = vmax.f32 %v738_v58, 0.0  ;;  %1964 = vmatpush1.bf16.msra.mxu0 %v1963_v47  ;;  %v1383_v25 = vmul.f32 %v2618_v8, %v1159_v52  ;;  %1996 = vmatpush1.bf16.msra.mxu1 %v1995_v48  ;;  %v2694_v58 = vpop.permute.xlu0 %413 }
 0x103   : > { %v1165_v26 = vmax.f32 %v579_v14, 0.0  ;;  %v1167_v27 = vmax.f32 %v740_v15, 0.0  ;;  %v582_v28 = vpop.f32.mrb[12].mxu0  ;;  %v743_v29 = vpop.f32.mrb[12].mxu1 }
 0x104   : > { %v1388_v30 = vmul.f32 %v2620_v9, %v1164_v20  ;;  %v1390_v31 = vmul.f32 %v2620_v9, %v1166_v21  ;;  %v583_v33 = vadd.f32 %v582_v28, %v2614_v6  ;;  %v744_v34 = vadd.f32 %v743_v29, %v2614_v6  ;;  %v584_v36 = vpop.f32.mrb[13].mxu0  ;;  %v745_v37 = vpop.f32.mrb[13].mxu1 }
 0x105   : > { %v1389_v38 = vmul.f32 %v2620_v9, %v1165_v26  ;;  %v1391_v39 = vmul.f32 %v2620_v9, %v1167_v27  ;;  %v585_v40 = vadd.f32 %v584_v36, %v2614_v6  ;;  %v746_v41 = vadd.f32 %v745_v37, %v2614_v6 }
 0x106   : > { %v1967_v42 = vpack.c.bf16 %v1388_v30, %v1380_v18  ;;  %v1999_v43 = vpack.c.bf16 %v1390_v31, %v1382_v19  ;;  %v1172_v44 = vmax.f32 %v583_v33, 0.0  ;;  %v1174_v45 = vmax.f32 %v744_v34, 0.0 }
 0x107   : > { %v1173_v46 = vmax.f32 %v585_v40, 0.0  ;;  %v1175_v47 = vmax.f32 %v746_v41, 0.0  ;;  %v588_v48 = vpop.f32.mrb[14].mxu0  ;;  %v749_v49 = vpop.f32.mrb[14].mxu1  ;;  %v1965_v50 = vpack.c.bf16 %v1389_v38, %v1381_v22  ;;  %v1997_v51 = vpack.c.bf16 %v1391_v39, %v1383_v25 }
 0x108   : > { %v589_v52 = vadd.f32 %v588_v48, %v2616_v7  ;;  %v750_v53 = vadd.f32 %v749_v49, %v2616_v7  ;;  %v590_v54 = vpop.f32.mrb[15].mxu0  ;;  %v751_v55 = vpop.f32.mrb[15].mxu1  ;;  %v1396_v13 = vmul.f32 %v2634_v32, %v1172_v44  ;;  %v1398_v14 = vmul.f32 %v2634_v32, %v1174_v45 }
 0x109   : > { %v591_v56 = vadd.f32 %v590_v54, %v2616_v7  ;;  %v752_v57 = vadd.f32 %v751_v55, %v2616_v7  ;;  %1966 = vmatprep.subr.bf16.mxu0 %v1965_v50  ;;  %1998 = vmatprep.subr.bf16.mxu1 %v1997_v51  ;;  %v1397_v19 = vmul.f32 %v2634_v32, %v1173_v46  ;;  %v2714_v55 = vpop.permute.xlu0 %1320 }
 0x10a   : > { %v1180_v15 = vmax.f32 %v589_v52, 0.0  ;;  %v1182_v18 = vmax.f32 %v750_v53, 0.0  ;;  %1968 = vmatpush1.bf16.msra.mxu0 %v1967_v42  ;;  %v1399_v20 = vmul.f32 %v2634_v32, %v1175_v47  ;;  %2000 = vmatpush1.bf16.msra.mxu1 %v1999_v43 }
 0x10b   : > { %v1181_v21 = vmax.f32 %v591_v56, 0.0  ;;  %v1183_v22 = vmax.f32 %v752_v57, 0.0  ;;  %v594_v25 = vpop.f32.mrb[16].mxu0  ;;  %v755_v26 = vpop.f32.mrb[16].mxu1 }
 0x10c   : > { %v1404_v27 = vmul.f32 %v2638_v35, %v1180_v15  ;;  %v1406_v28 = vmul.f32 %v2638_v35, %v1182_v18  ;;  %v595_v29 = vadd.f32 %v594_v25, %v2622_v10  ;;  %v756_v30 = vadd.f32 %v755_v26, %v2622_v10  ;;  %v596_v31 = vpop.f32.mrb[17].mxu0  ;;  %v757_v33 = vpop.f32.mrb[17].mxu1 }
 0x10d   : > { %v1405_v34 = vmul.f32 %v2638_v35, %v1181_v21  ;;  %v1407_v36 = vmul.f32 %v2638_v35, %v1183_v22  ;;  %v597_v37 = vadd.f32 %v596_v31, %v2622_v10  ;;  %v758_v38 = vadd.f32 %v757_v33, %v2622_v10  ;;  %v2716_v56 = vpop.permute.xlu1 %1325 }
 0x10e   : > { %v1971_v39 = vpack.c.bf16 %v1404_v27, %v1396_v13  ;;  %v2003_v40 = vpack.c.bf16 %v1406_v28, %v1398_v14  ;;  %v1188_v41 = vmax.f32 %v595_v29, 0.0  ;;  %v1190_v42 = vmax.f32 %v756_v30, 0.0 }
 0x10f   : > { %v1189_v43 = vmax.f32 %v597_v37, 0.0  ;;  %v1191_v44 = vmax.f32 %v758_v38, 0.0  ;;  %v600_v45 = vpop.f32.mrb[18].mxu0  ;;  %v761_v46 = vpop.f32.mrb[18].mxu1  ;;  %v1969_v47 = vpack.c.bf16 %v1405_v34, %v1397_v19  ;;  %v2001_v48 = vpack.c.bf16 %v1407_v36, %v1399_v20 }
 0x110   : > { %v601_v49 = vadd.f32 %v600_v45, %v2624_v11  ;;  %v762_v50 = vadd.f32 %v761_v46, %v2624_v11  ;;  %v602_v51 = vpop.f32.mrb[19].mxu0  ;;  %v763_v52 = vpop.f32.mrb[19].mxu1  ;;  %v1412_v57 = vmul.f32 %v2674_v16, %v1188_v41  ;;  %v1414_v13 = vmul.f32 %v2674_v16, %v1190_v42 }
 0x111   : > { %v603_v53 = vadd.f32 %v602_v51, %v2624_v11  ;;  %v764_v54 = vadd.f32 %v763_v52, %v2624_v11  ;;  %1970 = vmatprep.subr.bf16.mxu0 %v1969_v47  ;;  %2002 = vmatprep.subr.bf16.mxu1 %v2001_v48  ;;  %v1413_v18 = vmul.f32 %v2674_v16, %v1189_v43 }
 0x112   : > { %v1196_v14 = vmax.f32 %v601_v49, 0.0  ;;  %v1198_v15 = vmax.f32 %v762_v50, 0.0  ;;  %1972 = vmatpush1.bf16.msra.mxu0 %v1971_v39  ;;  %v1415_v19 = vmul.f32 %v2674_v16, %v1191_v44  ;;  %2004 = vmatpush1.bf16.msra.mxu1 %v2003_v40 }
 0x113   : > { %v1197_v20 = vmax.f32 %v603_v53, 0.0  ;;  %v1199_v21 = vmax.f32 %v764_v54, 0.0  ;;  %v606_v22 = vpop.f32.mrb[20].mxu0  ;;  %v767_v25 = vpop.f32.mrb[20].mxu1 }
 0x114   : > { %v1420_v26 = vmul.f32 %v2676_v17, %v1196_v14  ;;  %v1422_v27 = vmul.f32 %v2676_v17, %v1198_v15  ;;  %v607_v28 = vadd.f32 %v606_v22, %v2654_v23  ;;  %v768_v29 = vadd.f32 %v767_v25, %v2654_v23  ;;  %v608_v30 = vpop.f32.mrb[21].mxu0  ;;  %v769_v31 = vpop.f32.mrb[21].mxu1 }
 0x115   : > { %v1421_v33 = vmul.f32 %v2676_v17, %v1197_v20  ;;  %v1423_v34 = vmul.f32 %v2676_v17, %v1199_v21  ;;  %v609_v36 = vadd.f32 %v608_v30, %v2654_v23  ;;  %v770_v37 = vadd.f32 %v769_v31, %v2654_v23  ;;  %v2734_v54 = vpop.permute.xlu0 %423 }
 0x116   : > { %v1975_v38 = vpack.c.bf16 %v1420_v26, %v1412_v57  ;;  %v2007_v39 = vpack.c.bf16 %v1422_v27, %v1414_v13  ;;  %v1204_v40 = vmax.f32 %v607_v28, 0.0  ;;  %v1206_v41 = vmax.f32 %v768_v29, 0.0  ;;  %v2736_v57 = vpop.permute.xlu1 %428 }
 0x117   : > { %v1205_v42 = vmax.f32 %v609_v36, 0.0  ;;  %v1207_v43 = vmax.f32 %v770_v37, 0.0  ;;  %v612_v44 = vpop.f32.mrb[22].mxu0  ;;  %v773_v45 = vpop.f32.mrb[22].mxu1  ;;  %v1973_v46 = vpack.c.bf16 %v1421_v33, %v1413_v18  ;;  %v2005_v47 = vpack.c.bf16 %v1423_v34, %v1415_v19 }
 0x118   : > { %v613_v48 = vadd.f32 %v612_v44, %v2656_v24  ;;  %v774_v49 = vadd.f32 %v773_v45, %v2656_v24  ;;  %v614_v50 = vpop.f32.mrb[23].mxu0  ;;  %v775_v51 = vpop.f32.mrb[23].mxu1  ;;  %v1428_v13 = vmul.f32 %v2714_v55, %v1204_v40  ;;  %v1430_v14 = vmul.f32 %v2714_v55, %v1206_v41 }
 0x119   : > { %v615_v52 = vadd.f32 %v614_v50, %v2656_v24  ;;  %v776_v53 = vadd.f32 %v775_v51, %v2656_v24  ;;  %1974 = vmatprep.subr.bf16.mxu0 %v1973_v46  ;;  %2006 = vmatprep.subr.bf16.mxu1 %v2005_v47  ;;  %v1429_v19 = vmul.f32 %v2714_v55, %v1205_v42 }
 0x11a   : > { %v1212_v15 = vmax.f32 %v613_v48, 0.0  ;;  %v1214_v18 = vmax.f32 %v774_v49, 0.0  ;;  %1976 = vmatpush1.bf16.msra.mxu0 %v1975_v38  ;;  %v1431_v20 = vmul.f32 %v2714_v55, %v1207_v43  ;;  %2008 = vmatpush1.bf16.msra.mxu1 %v2007_v39 }
 0x11b   : > { %v1213_v21 = vmax.f32 %v615_v52, 0.0  ;;  %v1215_v22 = vmax.f32 %v776_v53, 0.0  ;;  %v618_v25 = vpop.f32.mrb[24].mxu0  ;;  %v779_v26 = vpop.f32.mrb[24].mxu1 }
 0x11c   : > { %v1436_v27 = vmul.f32 %v2716_v56, %v1212_v15  ;;  %v1438_v28 = vmul.f32 %v2716_v56, %v1214_v18  ;;  %v619_v29 = vadd.f32 %v618_v25, %v2694_v58  ;;  %v780_v30 = vadd.f32 %v779_v26, %v2694_v58  ;;  %v620_v31 = vpop.f32.mrb[25].mxu0  ;;  %v781_v33 = vpop.f32.mrb[25].mxu1 }
 0x11d   : > { %v1437_v34 = vmul.f32 %v2716_v56, %v1213_v21  ;;  %v1439_v36 = vmul.f32 %v2716_v56, %v1215_v22  ;;  %v621_v37 = vadd.f32 %v620_v31, %v2694_v58  ;;  %v782_v38 = vadd.f32 %v781_v33, %v2694_v58  ;;  %v2752_v53 = vpop.permute.xlu0 %1330 }
 0x11e   : > { %v1979_v39 = vpack.c.bf16 %v1436_v27, %v1428_v13  ;;  %v2011_v40 = vpack.c.bf16 %v1438_v28, %v1430_v14  ;;  %v1220_v41 = vmax.f32 %v619_v29, 0.0  ;;  %v1222_v42 = vmax.f32 %v780_v30, 0.0  ;;  %v2756_v14 = vpop.permute.xlu1 %1335 }
 0x11f   : > { %v1221_v43 = vmax.f32 %v621_v37, 0.0  ;;  %v1223_v44 = vmax.f32 %v782_v38, 0.0  ;;  %v624_v45 = vpop.f32.mrb[26].mxu0  ;;  %v785_v46 = vpop.f32.mrb[26].mxu1  ;;  %v1977_v47 = vpack.c.bf16 %v1437_v34, %v1429_v19  ;;  %v2009_v48 = vpack.c.bf16 %v1439_v36, %v1431_v20 }
 0x120   : > { %v625_v49 = vadd.f32 %v624_v45, %v2696_v12  ;;  %v786_v50 = vadd.f32 %v785_v46, %v2696_v12  ;;  %v626_v51 = vpop.f32.mrb[27].mxu0  ;;  %v787_v52 = vpop.f32.mrb[27].mxu1  ;;  %v1444_v18 = vmul.f32 %v2752_v53, %v1220_v41  ;;  %v1446_v19 = vmul.f32 %v2752_v53, %v1222_v42 }
 0x121   : > { %v627_v15 = vadd.f32 %v626_v51, %v2696_v12  ;;  %v788_v13 = vadd.f32 %v787_v52, %v2696_v12  ;;  %1978 = vmatprep.subr.bf16.mxu0 %v1977_v47  ;;  %2010 = vmatprep.subr.bf16.mxu1 %v2009_v48  ;;  %v1445_v22 = vmul.f32 %v2752_v53, %v1221_v43 }
 0x122   : > { %v1228_v20 = vmax.f32 %v625_v49, 0.0  ;;  %v1230_v21 = vmax.f32 %v786_v50, 0.0  ;;  %1980 = vmatpush1.bf16.msra.mxu0 %v1979_v39  ;;  %v1447_v25 = vmul.f32 %v2752_v53, %v1223_v44  ;;  %2012 = vmatpush1.bf16.msra.mxu1 %v2011_v40 }
 0x123   : > { %v1229_v26 = vmax.f32 %v627_v15, 0.0  ;;  %v1231_v27 = vmax.f32 %v788_v13, 0.0  ;;  %v630_v28 = vpop.f32.mrb[28].mxu0  ;;  %v791_v29 = vpop.f32.mrb[28].mxu1 }
 0x124   : > { %v1452_v30 = vmul.f32 %v2756_v14, %v1228_v20  ;;  %v1454_v31 = vmul.f32 %v2756_v14, %v1230_v21  ;;  %v631_v33 = vadd.f32 %v630_v28, %v2734_v54  ;;  %v792_v34 = vadd.f32 %v791_v29, %v2734_v54  ;;  %v632_v36 = vpop.f32.mrb[29].mxu0  ;;  %v793_v37 = vpop.f32.mrb[29].mxu1 }
 0x125   : > { %v1453_v38 = vmul.f32 %v2756_v14, %v1229_v26  ;;  %v1455_v39 = vmul.f32 %v2756_v14, %v1231_v27  ;;  %v633_v41 = vadd.f32 %v632_v36, %v2734_v54  ;;  %v794_v40 = vadd.f32 %v793_v37, %v2734_v54  ;;  %v2772_v21 = vpop.permute.xlu0 %1340 }
 0x126   : > { %v1983_v42 = vpack.c.bf16 %v1452_v30, %v1444_v18  ;;  %v2015_v43 = vpack.c.bf16 %v1454_v31, %v1446_v19  ;;  %v1236_v44 = vmax.f32 %v631_v33, 0.0  ;;  %v1238_v45 = vmax.f32 %v792_v34, 0.0  ;;  %v2776_v19 = vpop.permute.xlu1 %1345 }
 0x127   : > { %v1237_v46 = vmax.f32 %v633_v41, 0.0  ;;  %v1239_v47 = vmax.f32 %v794_v40, 0.0  ;;  %v636_v48 = vpop.f32.mrb[30].mxu0  ;;  %v797_v49 = vpop.f32.mrb[30].mxu1  ;;  %v1981_v50 = vpack.c.bf16 %v1453_v38, %v1445_v22  ;;  %v2013_v51 = vpack.c.bf16 %v1455_v39, %v1447_v25 }
 0x128   : > { %v637_v52 = vadd.f32 %v636_v48, %v2736_v57  ;;  %v798_v15 = vadd.f32 %v797_v49, %v2736_v57  ;;  %v638_v13 = vpop.f32.mrb[31].mxu0  ;;  %v799_v20 = vpop.f32.mrb[31].mxu1  ;;  %v1460_v27 = vmul.f32 %v2772_v21, %v1236_v44  ;;  %v1462_v22 = vmul.f32 %v2772_v21, %v1238_v45 }
 0x129   : > { %v639_v26 = vadd.f32 %v638_v13, %v2736_v57  ;;  %v800_v18 = vadd.f32 %v799_v20, %v2736_v57  ;;  %1982 = vmatprep.subr.bf16.mxu0 %v1981_v50  ;;  %2014 = vmatprep.subr.bf16.mxu1 %v2013_v51  ;;  %v1461_v29 = vmul.f32 %v2772_v21, %v1237_v46 }
 0x12a   : > { %v1244_v25 = vmax.f32 %v637_v52, 0.0  ;;  %v1246_v28 = vmax.f32 %v798_v15, 0.0  ;;  %1984 = vmatpush1.bf16.msra.mxu0 %v1983_v42  ;;  %v1463_v30 = vmul.f32 %v2772_v21, %v1239_v47  ;;  %2016 = vmatpush1.bf16.msra.mxu1 %v2015_v43 }
 0x12b   : > { %v1245_v31 = vmax.f32 %v639_v26, 0.0  ;;  %v1247_v33 = vmax.f32 %v800_v18, 0.0  ;;  %v868_v34 = vpop.f32.mrb[32].mxu0  ;;  %v1029_v36 = vpop.f32.mrb[32].mxu1 }
 0x12c   : > { %v1468_v37 = vmul.f32 %v2776_v19, %v1244_v25  ;;  %v1470_v38 = vmul.f32 %v2776_v19, %v1246_v28  ;;  %v869_v39 = vadd.f32 %v868_v34, %v2594_v59  ;;  %v1030_v41 = vadd.f32 %v1029_v36, %v2594_v59  ;;  %v870_v40 = vpop.f32.mrb[33].mxu0  ;;  %v1031_v44 = vpop.f32.mrb[33].mxu1 }
 0x12d   : > { %v1469_v42 = vmul.f32 %v2776_v19, %v1245_v31  ;;  %v1471_v45 = vmul.f32 %v2776_v19, %v1247_v33  ;;  %v871_v46 = vadd.f32 %v870_v40, %v2594_v59  ;;  %v1032_v43 = vadd.f32 %v1031_v44, %v2594_v59 }
 0x12e   : > { %v1987_v47 = vpack.c.bf16 %v1468_v37, %v1460_v27  ;;  %v2019_v48 = vpack.c.bf16 %v1470_v38, %v1462_v22  ;;  %v1128_v49 = vmax.f32 %v869_v39, 0.0  ;;  %v1130_v50 = vmax.f32 %v1030_v41, 0.0 }
 0x12f   : > { %v1129_v51 = vmax.f32 %v871_v46, 0.0  ;;  %v1131_v52 = vmax.f32 %v1032_v43, 0.0  ;;  %v874_v15 = vpop.f32.mrb[34].mxu0  ;;  %v1035_v13 = vpop.f32.mrb[34].mxu1  ;;  %v1985_v20 = vpack.c.bf16 %v1469_v42, %v1461_v29  ;;  %v2017_v26 = vpack.c.bf16 %v1471_v45, %v1463_v30  ;;  %v2799_v29 = vld [vmem:[%s2949_s4] sm:$0xff] }
 0x130   : > { %v875_v18 = vadd.f32 %v874_v15, %v2598_v61  ;;  %v1036_v25 = vadd.f32 %v1035_v13, %v2598_v61  ;;  %v876_v28 = vpop.f32.mrb[35].mxu0  ;;  %v1037_v31 = vpop.f32.mrb[35].mxu1  ;;  %v1352_v27 = vmul.f32 %v2602_v63, %v1128_v49  ;;  %v1354_v22 = vmul.f32 %v2602_v63, %v1130_v50 }
 0x131   : > { %v877_v33 = vadd.f32 %v876_v28, %v2598_v61  ;;  %v1038_v59 = vadd.f32 %v1037_v31, %v2598_v61  ;;  %1986 = vmatprep.subr.bf16.mxu0 %v1985_v20  ;;  %2018 = vmatprep.subr.bf16.mxu1 %v2017_v26  ;;  %v1353_v30 = vmul.f32 %v2602_v63, %v1129_v51 }
 0x132   : > { %v1136_v34 = vmax.f32 %v875_v18, 0.0  ;;  %v1138_v36 = vmax.f32 %v1036_v25, 0.0  ;;  %1988 = vmatpush1.bf16.msra.mxu0 %v1987_v47  ;;  %v1355_v37 = vmul.f32 %v2602_v63, %v1131_v52  ;;  %2020 = vmatpush1.bf16.msra.mxu1 %v2019_v48 }
 0x133   : > { %v1137_v38 = vmax.f32 %v877_v33, 0.0  ;;  %v1139_v61 = vmax.f32 %v1038_v59, 0.0  ;;  %v880_v39 = vpop.f32.mrb[36].mxu0  ;;  %v1041_v41 = vpop.f32.mrb[36].mxu1 }
 0x134   : > { %v1360_v40 = vmul.f32 %v2604_v1, %v1136_v34  ;;  %v1362_v44 = vmul.f32 %v2604_v1, %v1138_v36  ;;  %v881_v42 = vadd.f32 %v880_v39, %v2596_v60  ;;  %v1042_v45 = vadd.f32 %v1041_v41, %v2596_v60  ;;  %v882_v46 = vpop.f32.mrb[37].mxu0  ;;  %v1043_v43 = vpop.f32.mrb[37].mxu1 }
 0x135   : > { %v1361_v47 = vmul.f32 %v2604_v1, %v1137_v38  ;;  %v1363_v49 = vmul.f32 %v2604_v1, %v1139_v61  ;;  %v883_v63 = vadd.f32 %v882_v46, %v2596_v60  ;;  %v1044_v48 = vadd.f32 %v1043_v43, %v2596_v60  ;;  %1548 = vmatmul.mubr.f32.vlgmr.msra.gmra.mrb[64].mxu0 %v2799_v29 }
 0x136   : > { %v2023_v50 = vpack.c.bf16 %v1360_v40, %v1352_v27  ;;  %v2055_v51 = vpack.c.bf16 %v1362_v44, %v1354_v22  ;;  %v1144_v52 = vmax.f32 %v881_v42, 0.0  ;;  %v1146_v15 = vmax.f32 %v1042_v45, 0.0  ;;  %1619 = vmatmul.mubr.f32.vlgmr.msra.gmra.mrb[64].mxu1 %v2799_v29  ;;  %1689 = vmatprep.mubr.f32.mxu0 %v2169_v0 }
 0x137   : > { %v1145_v13 = vmax.f32 %v883_v63, 0.0  ;;  %v1147_v20 = vmax.f32 %v1044_v48, 0.0  ;;  %v886_v26 = vpop.f32.mrb[38].mxu0  ;;  %v1047_v18 = vpop.f32.mrb[38].mxu1  ;;  %v2021_v25 = vpack.c.bf16 %v1361_v47, %v1353_v30  ;;  %v2053_v1 = vpack.c.bf16 %v1363_v49, %v1355_v37  ;;  %1760 = vmatprep.mubr.f32.mxu1 %v2169_v0 }
 0x138   : > { %v887_v60 = vadd.f32 %v886_v26, %v2600_v62  ;;  %v1048_v28 = vadd.f32 %v1047_v18, %v2600_v62  ;;  %v888_v31 = vpop.f32.mrb[39].mxu0  ;;  %v1049_v33 = vpop.f32.mrb[39].mxu1  ;;  %v1368_v22 = vmul.f32 %v2610_v4, %v1144_v52  ;;  %v1370_v34 = vmul.f32 %v2610_v4, %v1146_v15 }
 0x139   : > { %v889_v59 = vadd.f32 %v888_v31, %v2600_v62  ;;  %v1050_v27 = vadd.f32 %v1049_v33, %v2600_v62  ;;  %2022 = vmatprep.subr.bf16.mxu0 %v2021_v25  ;;  %2054 = vmatprep.subr.bf16.mxu1 %v2053_v1  ;;  %v1369_v0 = vmul.f32 %v2610_v4, %v1145_v13 }
 0x13a   : > { %v1152_v36 = vmax.f32 %v887_v60, 0.0  ;;  %v1154_v30 = vmax.f32 %v1048_v28, 0.0  ;;  %2024 = vmatpush1.bf16.msra.mxu0 %v2023_v50  ;;  %v1371_v37 = vmul.f32 %v2610_v4, %v1147_v20  ;;  %2056 = vmatpush1.bf16.msra.mxu1 %v2055_v51 }
 0x13b   : > { %v1153_v38 = vmax.f32 %v889_v59, 0.0  ;;  %v1155_v61 = vmax.f32 %v1050_v27, 0.0  ;;  %v892_v39 = vpop.f32.mrb[40].mxu0  ;;  %v1053_v41 = vpop.f32.mrb[40].mxu1 }
 0x13c   : > { %v1376_v62 = vmul.f32 %v2612_v5, %v1152_v36  ;;  %v1378_v40 = vmul.f32 %v2612_v5, %v1154_v30  ;;  %v893_v44 = vadd.f32 %v892_v39, %v2606_v2  ;;  %v1054_v42 = vadd.f32 %v1053_v41, %v2606_v2  ;;  %v894_v45 = vpop.f32.mrb[41].mxu0  ;;  %v1055_v46 = vpop.f32.mrb[41].mxu1 }
 0x13d   : > { %v1377_v43 = vmul.f32 %v2612_v5, %v1153_v38  ;;  %v1379_v47 = vmul.f32 %v2612_v5, %v1155_v61  ;;  %v895_v4 = vadd.f32 %v894_v45, %v2606_v2  ;;  %v1056_v49 = vadd.f32 %v1055_v46, %v2606_v2 }
 0x13e   : > { %v2027_v63 = vpack.c.bf16 %v1376_v62, %v1368_v22  ;;  %v2059_v48 = vpack.c.bf16 %v1378_v40, %v1370_v34  ;;  %v1160_v50 = vmax.f32 %v893_v44, 0.0  ;;  %v1162_v51 = vmax.f32 %v1054_v42, 0.0 }
 0x13f   : > { %v1161_v52 = vmax.f32 %v895_v4, 0.0  ;;  %v1163_v15 = vmax.f32 %v1056_v49, 0.0  ;;  %v898_v13 = vpop.f32.mrb[42].mxu0  ;;  %v1059_v20 = vpop.f32.mrb[42].mxu1  ;;  %v2025_v26 = vpack.c.bf16 %v1377_v43, %v1369_v0  ;;  %v2057_v18 = vpack.c.bf16 %v1379_v47, %v1371_v37 }
 0x140   : > { %v899_v25 = vadd.f32 %v898_v13, %v2608_v3  ;;  %v1060_v1 = vadd.f32 %v1059_v20, %v2608_v3  ;;  %v900_v60 = vpop.f32.mrb[43].mxu0  ;;  %v1061_v5 = vpop.f32.mrb[43].mxu1  ;;  %v1384_v31 = vmul.f32 %v2618_v8, %v1160_v50  ;;  %v1386_v33 = vmul.f32 %v2618_v8, %v1162_v51 }
 0x141   : > { %v901_v28 = vadd.f32 %v900_v60, %v2608_v3  ;;  %v1062_v2 = vadd.f32 %v1061_v5, %v2608_v3  ;;  %2026 = vmatprep.subr.bf16.mxu0 %v2025_v26  ;;  %2058 = vmatprep.subr.bf16.mxu1 %v2057_v18  ;;  %v1385_v22 = vmul.f32 %v2618_v8, %v1161_v52 }
 0x142   : > { %v1168_v59 = vmax.f32 %v899_v25, 0.0  ;;  %v1170_v27 = vmax.f32 %v1060_v1, 0.0  ;;  %2028 = vmatpush1.bf16.msra.mxu0 %v2027_v63  ;;  %v1387_v34 = vmul.f32 %v2618_v8, %v1163_v15  ;;  %2060 = vmatpush1.bf16.msra.mxu1 %v2059_v48 }
 0x143   : > { %v1169_v36 = vmax.f32 %v901_v28, 0.0  ;;  %v1171_v30 = vmax.f32 %v1062_v2, 0.0  ;;  %v904_v0 = vpop.f32.mrb[44].mxu0  ;;  %v1065_v37 = vpop.f32.mrb[44].mxu1 }
 0x144   : > { %v1392_v3 = vmul.f32 %v2620_v9, %v1168_v59  ;;  %v1394_v38 = vmul.f32 %v2620_v9, %v1170_v27  ;;  %v905_v61 = vadd.f32 %v904_v0, %v2614_v6  ;;  %v1066_v39 = vadd.f32 %v1065_v37, %v2614_v6  ;;  %v906_v41 = vpop.f32.mrb[45].mxu0  ;;  %v1067_v62 = vpop.f32.mrb[45].mxu1 }
 0x145   : > { %v1393_v40 = vmul.f32 %v2620_v9, %v1169_v36  ;;  %v1395_v44 = vmul.f32 %v2620_v9, %v1171_v30  ;;  %v907_v8 = vadd.f32 %v906_v41, %v2614_v6  ;;  %v1068_v42 = vadd.f32 %v1067_v62, %v2614_v6 }
 0x146   : > { %v2031_v45 = vpack.c.bf16 %v1392_v3, %v1384_v31  ;;  %v2063_v46 = vpack.c.bf16 %v1394_v38, %v1386_v33  ;;  %v1176_v43 = vmax.f32 %v905_v61, 0.0  ;;  %v1178_v47 = vmax.f32 %v1066_v39, 0.0 }
 0x147   : > { %v1177_v4 = vmax.f32 %v907_v8, 0.0  ;;  %v1179_v49 = vmax.f32 %v1068_v42, 0.0  ;;  %v910_v63 = vpop.f32.mrb[46].mxu0  ;;  %v1071_v48 = vpop.f32.mrb[46].mxu1  ;;  %v2029_v50 = vpack.c.bf16 %v1393_v40, %v1385_v22  ;;  %v2061_v51 = vpack.c.bf16 %v1395_v44, %v1387_v34 }
 0x148   : > { %v911_v52 = vadd.f32 %v910_v63, %v2616_v7  ;;  %v1072_v15 = vadd.f32 %v1071_v48, %v2616_v7  ;;  %v912_v13 = vpop.f32.mrb[47].mxu0  ;;  %v1073_v9 = vpop.f32.mrb[47].mxu1  ;;  %v1400_v26 = vmul.f32 %v2634_v32, %v1176_v43  ;;  %v1402_v18 = vmul.f32 %v2634_v32, %v1178_v47 }
 0x149   : > { %v913_v20 = vadd.f32 %v912_v13, %v2616_v7  ;;  %v1074_v6 = vadd.f32 %v1073_v9, %v2616_v7  ;;  %2030 = vmatprep.subr.bf16.mxu0 %v2029_v50  ;;  %2062 = vmatprep.subr.bf16.mxu1 %v2061_v51  ;;  %v1401_v60 = vmul.f32 %v2634_v32, %v1177_v4 }
 0x14a   : > { %v1184_v25 = vmax.f32 %v911_v52, 0.0  ;;  %v1186_v1 = vmax.f32 %v1072_v15, 0.0  ;;  %2032 = vmatpush1.bf16.msra.mxu0 %v2031_v45  ;;  %v1403_v5 = vmul.f32 %v2634_v32, %v1179_v49  ;;  %2064 = vmatpush1.bf16.msra.mxu1 %v2063_v46 }
 0x14b   : > { %v1185_v28 = vmax.f32 %v913_v20, 0.0  ;;  %v1187_v2 = vmax.f32 %v1074_v6, 0.0  ;;  %v916_v31 = vpop.f32.mrb[48].mxu0  ;;  %v1077_v33 = vpop.f32.mrb[48].mxu1 }
 0x14c   : > { %v1408_v7 = vmul.f32 %v2638_v35, %v1184_v25  ;;  %v1410_v59 = vmul.f32 %v2638_v35, %v1186_v1  ;;  %v917_v27 = vadd.f32 %v916_v31, %v2622_v10  ;;  %v1078_v22 = vadd.f32 %v1077_v33, %v2622_v10  ;;  %v918_v34 = vpop.f32.mrb[49].mxu0  ;;  %v1079_v36 = vpop.f32.mrb[49].mxu1 }
 0x14d   : > { %v1409_v30 = vmul.f32 %v2638_v35, %v1185_v28  ;;  %v1411_v0 = vmul.f32 %v2638_v35, %v1187_v2  ;;  %v919_v32 = vadd.f32 %v918_v34, %v2622_v10  ;;  %v1080_v37 = vadd.f32 %v1079_v36, %v2622_v10 }
 0x14e   : > { %v2035_v3 = vpack.c.bf16 %v1408_v7, %v1400_v26  ;;  %v2067_v38 = vpack.c.bf16 %v1410_v59, %v1402_v18  ;;  %v1192_v61 = vmax.f32 %v917_v27, 0.0  ;;  %v1194_v39 = vmax.f32 %v1078_v22, 0.0 }
 0x14f   : > { %v1193_v41 = vmax.f32 %v919_v32, 0.0  ;;  %v1195_v62 = vmax.f32 %v1080_v37, 0.0  ;;  %v922_v40 = vpop.f32.mrb[50].mxu0  ;;  %v1083_v44 = vpop.f32.mrb[50].mxu1  ;;  %v2033_v8 = vpack.c.bf16 %v1409_v30, %v1401_v60  ;;  %v2065_v42 = vpack.c.bf16 %v1411_v0, %v1403_v5 }
 0x150   : > { %v923_v45 = vadd.f32 %v922_v40, %v2624_v11  ;;  %v1084_v46 = vadd.f32 %v1083_v44, %v2624_v11  ;;  %v924_v43 = vpop.f32.mrb[51].mxu0  ;;  %v1085_v35 = vpop.f32.mrb[51].mxu1  ;;  %v1416_v4 = vmul.f32 %v2674_v16, %v1192_v61  ;;  %v1418_v49 = vmul.f32 %v2674_v16, %v1194_v39 }
 0x151   : > { %v925_v47 = vadd.f32 %v924_v43, %v2624_v11  ;;  %v1086_v10 = vadd.f32 %v1085_v35, %v2624_v11  ;;  %2034 = vmatprep.subr.bf16.mxu0 %v2033_v8  ;;  %2066 = vmatprep.subr.bf16.mxu1 %v2065_v42  ;;  %v1417_v50 = vmul.f32 %v2674_v16, %v1193_v41 }
 0x152   : > { %v1200_v63 = vmax.f32 %v923_v45, 0.0  ;;  %v1202_v48 = vmax.f32 %v1084_v46, 0.0  ;;  %2036 = vmatpush1.bf16.msra.mxu0 %v2035_v3  ;;  %v1419_v51 = vmul.f32 %v2674_v16, %v1195_v62  ;;  %2068 = vmatpush1.bf16.msra.mxu1 %v2067_v38 }
 0x153   : > { %v1201_v52 = vmax.f32 %v925_v47, 0.0  ;;  %v1203_v15 = vmax.f32 %v1086_v10, 0.0  ;;  %v928_v13 = vpop.f32.mrb[52].mxu0  ;;  %v1089_v9 = vpop.f32.mrb[52].mxu1 }
 0x154   : > { %v1424_v11 = vmul.f32 %v2676_v17, %v1200_v63  ;;  %v1426_v20 = vmul.f32 %v2676_v17, %v1202_v48  ;;  %v929_v6 = vadd.f32 %v928_v13, %v2654_v23  ;;  %v1090_v26 = vadd.f32 %v1089_v9, %v2654_v23  ;;  %v930_v18 = vpop.f32.mrb[53].mxu0  ;;  %v1091_v25 = vpop.f32.mrb[53].mxu1 }
 0x155   : > { %v1425_v1 = vmul.f32 %v2676_v17, %v1201_v52  ;;  %v1427_v60 = vmul.f32 %v2676_v17, %v1203_v15  ;;  %v931_v16 = vadd.f32 %v930_v18, %v2654_v23  ;;  %v1092_v5 = vadd.f32 %v1091_v25, %v2654_v23 }
 0x156   : > { %v2039_v28 = vpack.c.bf16 %v1424_v11, %v1416_v4  ;;  %v2071_v2 = vpack.c.bf16 %v1426_v20, %v1418_v49  ;;  %v1208_v31 = vmax.f32 %v929_v6, 0.0  ;;  %v1210_v33 = vmax.f32 %v1090_v26, 0.0 }
 0x157   : > { %v1209_v7 = vmax.f32 %v931_v16, 0.0  ;;  %v1211_v59 = vmax.f32 %v1092_v5, 0.0  ;;  %v934_v27 = vpop.f32.mrb[54].mxu0  ;;  %v1095_v22 = vpop.f32.mrb[54].mxu1  ;;  %v2037_v34 = vpack.c.bf16 %v1425_v1, %v1417_v50  ;;  %v2069_v36 = vpack.c.bf16 %v1427_v60, %v1419_v51 }
 0x158   : > { %v935_v30 = vadd.f32 %v934_v27, %v2656_v24  ;;  %v1096_v0 = vadd.f32 %v1095_v22, %v2656_v24  ;;  %v936_v32 = vpop.f32.mrb[55].mxu0  ;;  %v1097_v17 = vpop.f32.mrb[55].mxu1  ;;  %v1432_v3 = vmul.f32 %v2714_v55, %v1208_v31  ;;  %v1434_v38 = vmul.f32 %v2714_v55, %v1210_v33 }
 0x159   : > { %v937_v37 = vadd.f32 %v936_v32, %v2656_v24  ;;  %v1098_v23 = vadd.f32 %v1097_v17, %v2656_v24  ;;  %2038 = vmatprep.subr.bf16.mxu0 %v2037_v34  ;;  %2070 = vmatprep.subr.bf16.mxu1 %v2069_v36  ;;  %v1433_v41 = vmul.f32 %v2714_v55, %v1209_v7 }
 0x15a   : > { %v1216_v61 = vmax.f32 %v935_v30, 0.0  ;;  %v1218_v39 = vmax.f32 %v1096_v0, 0.0  ;;  %2040 = vmatpush1.bf16.msra.mxu0 %v2039_v28  ;;  %v1435_v62 = vmul.f32 %v2714_v55, %v1211_v59  ;;  %2072 = vmatpush1.bf16.msra.mxu1 %v2071_v2 }
 0x15b   : > { %v1217_v40 = vmax.f32 %v937_v37, 0.0  ;;  %v1219_v44 = vmax.f32 %v1098_v23, 0.0  ;;  %v940_v8 = vpop.f32.mrb[56].mxu0  ;;  %v1101_v42 = vpop.f32.mrb[56].mxu1 }
 0x15c   : > { %v1440_v24 = vmul.f32 %v2716_v56, %v1216_v61  ;;  %v1442_v45 = vmul.f32 %v2716_v56, %v1218_v39  ;;  %v941_v46 = vadd.f32 %v940_v8, %v2694_v58  ;;  %v1102_v43 = vadd.f32 %v1101_v42, %v2694_v58  ;;  %v942_v35 = vpop.f32.mrb[57].mxu0  ;;  %v1103_v47 = vpop.f32.mrb[57].mxu1 }
 0x15d   : > { %v1441_v10 = vmul.f32 %v2716_v56, %v1217_v40  ;;  %v1443_v4 = vmul.f32 %v2716_v56, %v1219_v44  ;;  %v943_v55 = vadd.f32 %v942_v35, %v2694_v58  ;;  %v1104_v49 = vadd.f32 %v1103_v47, %v2694_v58 }
 0x15e   : > { %v2043_v63 = vpack.c.bf16 %v1440_v24, %v1432_v3  ;;  %v2075_v48 = vpack.c.bf16 %v1442_v45, %v1434_v38  ;;  %v1224_v50 = vmax.f32 %v941_v46, 0.0  ;;  %v1226_v51 = vmax.f32 %v1102_v43, 0.0 }
 0x15f   : > { %v1225_v52 = vmax.f32 %v943_v55, 0.0  ;;  %v1227_v15 = vmax.f32 %v1104_v49, 0.0  ;;  %v946_v13 = vpop.f32.mrb[58].mxu0  ;;  %v1107_v9 = vpop.f32.mrb[58].mxu1  ;;  %v2041_v11 = vpack.c.bf16 %v1441_v10, %v1433_v41  ;;  %v2073_v20 = vpack.c.bf16 %v1443_v4, %v1435_v62 }
 0x160   : > { %v947_v6 = vadd.f32 %v946_v13, %v2696_v12  ;;  %v1108_v26 = vadd.f32 %v1107_v9, %v2696_v12  ;;  %v948_v18 = vpop.f32.mrb[59].mxu0  ;;  %v1109_v56 = vpop.f32.mrb[59].mxu1  ;;  %v1448_v1 = vmul.f32 %v2752_v53, %v1224_v50  ;;  %v1450_v60 = vmul.f32 %v2752_v53, %v1226_v51 }
 0x161   : > { %v949_v25 = vadd.f32 %v948_v18, %v2696_v12  ;;  %v1110_v58 = vadd.f32 %v1109_v56, %v2696_v12  ;;  %2042 = vmatprep.subr.bf16.mxu0 %v2041_v11  ;;  %2074 = vmatprep.subr.bf16.mxu1 %v2073_v20  ;;  %v1449_v28 = vmul.f32 %v2752_v53, %v1225_v52 }
 0x162   : > { %v1232_v16 = vmax.f32 %v947_v6, 0.0  ;;  %v1234_v5 = vmax.f32 %v1108_v26, 0.0  ;;  %2044 = vmatpush1.bf16.msra.mxu0 %v2043_v63  ;;  %v1451_v2 = vmul.f32 %v2752_v53, %v1227_v15  ;;  %2076 = vmatpush1.bf16.msra.mxu1 %v2075_v48 }
 0x163   : > { %v1233_v31 = vmax.f32 %v949_v25, 0.0  ;;  %v1235_v33 = vmax.f32 %v1110_v58, 0.0  ;;  %v952_v7 = vpop.f32.mrb[60].mxu0  ;;  %v1113_v59 = vpop.f32.mrb[60].mxu1 }
 0x164   : > { %v1456_v12 = vmul.f32 %v2756_v14, %v1232_v16  ;;  %v1458_v27 = vmul.f32 %v2756_v14, %v1234_v5  ;;  %v953_v22 = vadd.f32 %v952_v7, %v2734_v54  ;;  %v1114_v34 = vadd.f32 %v1113_v59, %v2734_v54  ;;  %v954_v36 = vpop.f32.mrb[61].mxu0  ;;  %v1115_v30 = vpop.f32.mrb[61].mxu1 }
 0x165   : > { %v1457_v0 = vmul.f32 %v2756_v14, %v1233_v31  ;;  %v1459_v32 = vmul.f32 %v2756_v14, %v1235_v33  ;;  %v955_v53 = vadd.f32 %v954_v36, %v2734_v54  ;;  %v1116_v17 = vadd.f32 %v1115_v30, %v2734_v54 }
 0x166   : > { %v2047_v37 = vpack.c.bf16 %v1456_v12, %v1448_v1  ;;  %v2079_v23 = vpack.c.bf16 %v1458_v27, %v1450_v60  ;;  %v1240_v41 = vmax.f32 %v953_v22, 0.0  ;;  %v1242_v62 = vmax.f32 %v1114_v34, 0.0 }
 0x167   : > { %v958_v3 = vpop.f32.mrb[62].mxu0  ;;  %v1119_v38 = vpop.f32.mrb[62].mxu1  ;;  %v2045_v61 = vpack.c.bf16 %v1457_v0, %v1449_v28  ;;  %v2077_v39 = vpack.c.bf16 %v1459_v32, %v1451_v2  ;;  %v1241_v24 = vmax.f32 %v955_v53, 0.0  ;;  %v1243_v14 = vmax.f32 %v1116_v17, 0.0 }
 0x168   : > { %v959_v40 = vadd.f32 %v958_v3, %v2736_v57  ;;  %v1120_v44 = vadd.f32 %v1119_v38, %v2736_v57  ;;  %v960_v8 = vpop.f32.mrb[63].mxu0  ;;  %v1121_v42 = vpop.f32.mrb[63].mxu1  ;;  %v1464_v10 = vmul.f32 %v2772_v21, %v1240_v41  ;;  %v1466_v4 = vmul.f32 %v2772_v21, %v1242_v62 }
 0x169   : > { %v961_v45 = vadd.f32 %v960_v8, %v2736_v57  ;;  %v1122_v54 = vadd.f32 %v1121_v42, %v2736_v57  ;;  %2046 = vmatprep.subr.bf16.mxu0 %v2045_v61  ;;  %2078 = vmatprep.subr.bf16.mxu1 %v2077_v39  ;;  %v1465_v63 = vmul.f32 %v2772_v21, %v1241_v24 }
 0x16a   : > { %v1248_v46 = vmax.f32 %v959_v40, 0.0  ;;  %v1250_v43 = vmax.f32 %v1120_v44, 0.0  ;;  %2048 = vmatpush1.bf16.msra.mxu0 %v2047_v37  ;;  %2080 = vmatpush1.bf16.msra.mxu1 %v2079_v23  ;;  %v1467_v57 = vmul.f32 %v2772_v21, %v1243_v14  ;;  %v1481_v21 = vpop.permute.xlu0 %1480 }
 0x16b   : > { %v1249_v35 = vmax.f32 %v961_v45, 0.0  ;;  %v1251_v47 = vmax.f32 %v1122_v54, 0.0 }
 0x16c   : > { %v1472_v55 = vmul.f32 %v2776_v19, %v1248_v46  ;;  %v1474_v49 = vmul.f32 %v2776_v19, %v1250_v43 }
 0x16d   : > { %v1473_v48 = vmul.f32 %v2776_v19, %v1249_v35  ;;  %v1475_v50 = vmul.f32 %v2776_v19, %v1251_v47 }
 0x16e   : > { %v2051_v51 = vpack.c.bf16 %v1472_v55, %v1464_v10  ;;  %v2083_v52 = vpack.c.bf16 %v1474_v49, %v1466_v4 }
 0x16f   : > { %v2049_v15 = vpack.c.bf16 %v1473_v48, %v1465_v63  ;;  %v2081_v13 = vpack.c.bf16 %v1475_v50, %v1467_v57 }
 0x171   : > { %2050 = vmatprep.subr.bf16.mxu0 %v2049_v15  ;;  %2082 = vmatprep.subr.bf16.mxu1 %v2081_v13 }
 0x172   : > { %2052 = vmatpush1.bf16.msra.mxu0 %v2051_v51  ;;  %2084 = vmatpush1.bf16.msra.mxu1 %v2083_v52 }
 0x175   : > { %1690 = vmatmul.mubr.f32.vlgmr.msra.gmra.mrb[66].mxu0 %v2799_v29  ;;  %1761 = vmatmul.mubr.f32.vlgmr.msra.gmra.mrb[66].mxu1 %v2799_v29 }
 0x208   : > { %v1549_v9 = vpop.f32.mrb[64].mxu0 }
 0x209   : > { %v1550_v19 = vadd.f32 %v1549_v9, %v1481_v21  ;;  %v1620_v11 = vpop.f32.mrb[64].mxu1  ;;  %v1551_v20 = vpop.f32.mrb[65].mxu0 }
 0x20a   : > { %v1621_v6 = vadd.f32 %v1620_v11, %v1481_v21  ;;  %v1552_v26 = vadd.f32 %v1551_v20, %v1481_v21  ;;  %v1622_v18 = vpop.f32.mrb[65].mxu1 }
 0x20b   : > { %1767 = vst [vmem:[%s309_s19] sm:$0xff] %v1550_v19  ;;  %v1623_v56 = vadd.f32 %v1622_v18, %v1481_v21 }
 0x20c   : > { %1769 = vst [vmem:[%s309_s19 + $0x10] sm:$0xff] %v1621_v6  ;;  %1768 = vst [vmem:[%s309_s19 + $0x8] sm:$0xff] %v1552_v26 }
 0x20d   : > { %1770 = vst [vmem:[%s309_s19 + $0x18] sm:$0xff] %v1623_v56 }
 0x248   : > { %v1691_v25 = vpop.f32.mrb[66].mxu0  ;;  %v1762_v29 = vpop.f32.mrb[66].mxu1 }
 0x249   : > { %v1692_v58 = vadd.f32 %v1691_v25, %v1481_v21  ;;  %v1763_v1 = vadd.f32 %v1762_v29, %v1481_v21  ;;  %v1693_v60 = vpop.f32.mrb[67].mxu0  ;;  %v1764_v16 = vpop.f32.mrb[67].mxu1 }
 0x24a   : > { %v1694_v5 = vadd.f32 %v1693_v60, %v1481_v21  ;;  %v1765_v28 = vadd.f32 %v1764_v16, %v1481_v21 }
 0x24b   : > { %1771 = vst [vmem:[%s309_s19 + $0x20] sm:$0xff] %v1692_v58  ;;  %1773 = vst [vmem:[%s309_s19 + $0x30] sm:$0xff] %v1763_v1 }
 0x24c   : > { %1772 = vst [vmem:[%s309_s19 + $0x28] sm:$0xff] %v1694_v5  ;;  %1774 = vst [vmem:[%s309_s19 + $0x38] sm:$0xff] %v1765_v28 }
 0x24d PF: > { %s16_s25 = sadd.s32 1, %s2167_s25   ;;  %s2952_s21 = smov %s2159_s23 }
 0x24e   : > { %p13_p7 = scmp.ge.s32.totalorder %s16_s25, 10   ;;  %s2953_s22 = smov %s2163_s24 }
 0x24f   : > { %s2954_s23 = smov %s2957_s26  ;;  %s2955_s24 = smov %s2961_s27 }
 0x250   :  { %15 = sbr.rel (!%p13_p7) target bundleno = 3 (0x3), region = 77 }

</bundles_post_ra>
